<compile_context>
chip_gen: v6e
topology: v6e:2x2x1
jax: 0.10.0
libtpu: 0.0.40
codegen_flags: <defaults>
</compile_context>

<pallas_src>
import functools

import jax
import jax.numpy as jnp
from jax.experimental import pallas as pl
from jax.experimental.pallas import tpu as pltpu


_VMEM_LIMIT = 32 * 1024 * 1024  # within every generation's scoped VMEM budget


# ----------------------------------------------------------------------------
# Pallas kernel: O = relu?(W @ P + bias)   (lane-dense: lanes = M = B*Ho*Wo)
# ----------------------------------------------------------------------------
def _matmul_bias_act_kernel(w_ref, p_ref, b_ref, o_ref, *, apply_relu):
    acc = jnp.dot(w_ref[...], p_ref[...], preferred_element_type=jnp.float32)
    acc = acc + b_ref[...]                    # (O, 1) bias broadcast over lanes
    if apply_relu:
        acc = jnp.maximum(acc, 0.0)
    o_ref[...] = acc.astype(o_ref.dtype)


def matmul_bias_act(w_mat, patches_t, bias, apply_relu,
                    *, compute_dtype=jnp.bfloat16):
    """w_mat: (O, K), patches_t: (K, M), bias: (O,) -> (O, M) float32."""
    O, K = w_mat.shape
    K2, M = patches_t.shape
    assert K == K2
    w_mat = w_mat.astype(compute_dtype)            # bf16 MXU operands
    patches_t = patches_t.astype(compute_dtype)
    bias_col = bias.reshape(O, 1).astype(jnp.float32)

    # Tile the lane (M) axis when it is large enough to be worth pipelining.
    tm = 512 if (M > 512 and M % 512 == 0) else M
    grid = (M // tm,)

    kernel = functools.partial(_matmul_bias_act_kernel, apply_relu=apply_relu)
    return pl.pallas_call(
        kernel,
        out_shape=jax.ShapeDtypeStruct((O, M), jnp.float32),
        grid=grid,
        in_specs=[
            pl.BlockSpec((O, K), lambda i: (0, 0)),     # weights (resident)
            pl.BlockSpec((K, tm), lambda i: (0, i)),    # patches^T, lane-tiled
            pl.BlockSpec((O, 1), lambda i: (0, 0)),     # bias column
        ],
        out_specs=pl.BlockSpec((O, tm), lambda i: (0, i)),
        compiler_params=pltpu.CompilerParams(
            dimension_semantics=("parallel",),
            vmem_limit_bytes=_VMEM_LIMIT),
    )(w_mat, patches_t, bias_col)


# ----------------------------------------------------------------------------
# Fused bottleneck: encoder Linear(32->L) + decoder Linear(L->32), one kernel.
# Lane dim = batch (tiny); everything stays in VMEM for the whole chain.
# ----------------------------------------------------------------------------
def _bottleneck_kernel(flat_ref, w5_ref, b5_ref, wd1_ref, bd1_ref, o_ref):
    z = jnp.dot(w5_ref[...], flat_ref[...], preferred_element_type=jnp.float32)
    z = z + b5_ref[...]
    h = jnp.dot(wd1_ref[...], z, preferred_element_type=jnp.float32)
    o_ref[...] = (h + bd1_ref[...]).astype(o_ref.dtype)


def bottleneck(flat_t, w5, b5, wd1, bd1):
    """flat_t: (32, B), w5: (L, 32), wd1: (32, L) -> (32, B)."""
    K, B = flat_t.shape
    L = w5.shape[0]
    return pl.pallas_call(
        _bottleneck_kernel,
        out_shape=jax.ShapeDtypeStruct((K, B), jnp.float32),
        grid=(1,),
        in_specs=[
            pl.BlockSpec((K, B), lambda i: (0, 0)),
            pl.BlockSpec((L, K), lambda i: (0, 0)),
            pl.BlockSpec((L, 1), lambda i: (0, 0)),
            pl.BlockSpec((K, L), lambda i: (0, 0)),
            pl.BlockSpec((K, 1), lambda i: (0, 0)),
        ],
        out_specs=pl.BlockSpec((K, B), lambda i: (0, 0)),
        compiler_params=pltpu.CompilerParams(
            dimension_semantics=("arbitrary",),
            vmem_limit_bytes=_VMEM_LIMIT),
    )(flat_t, w5, b5.reshape(L, 1), wd1, bd1.reshape(K, 1))


# ----------------------------------------------------------------------------
# Glue: channel-major im2col + conv / conv-transpose wrappers (layout only)
# ----------------------------------------------------------------------------
def _extract_patches_t(x_pad_cm, k, stride):
    """x_pad_cm: (C, B, Hp, Wp) already padded -> ((C*k*k, B*Ho*Wo), Ho, Wo).

    Row order (c, ki, kj) matches torch weight.reshape(O, C*k*k); column order
    is (b, y, x), so the (O, M) matmul output reshapes straight to (O,B,Ho,Wo).
    """
    C, B, Hp, Wp = x_pad_cm.shape
    Ho = (Hp - k) // stride + 1
    Wo = (Wp - k) // stride + 1
    taps = []
    for ki in range(k):
        for kj in range(k):
            taps.append(
                x_pad_cm[:, :,
                         ki:ki + stride * (Ho - 1) + 1:stride,
                         kj:kj + stride * (Wo - 1) + 1:stride])
    p = jnp.stack(taps, axis=1)                       # (C, k*k, B, Ho, Wo)
    return p.reshape(C * k * k, B * Ho * Wo), Ho, Wo


def conv2d_cm(x_cm, w, b, stride, padding, apply_relu):
    """Conv2d on channel-major input.  x_cm: (C,B,H,W), w: (O,C,k,k), b: (O,)."""
    C, B, H, W = x_cm.shape
    O, _, k, _ = w.shape
    x_pad = jnp.pad(x_cm, ((0, 0), (0, 0), (padding, padding), (padding, padding)))
    patches_t, Ho, Wo = _extract_patches_t(x_pad, k, stride)
    out = matmul_bias_act(w.reshape(O, C * k * k), patches_t, b, apply_relu)
    return out.reshape(O, B, Ho, Wo)


def conv_transpose2d_cm(x_cm, w, b, stride, padding, output_padding, apply_relu):
    """ConvTranspose2d on channel-major input.
    x_cm: (Cin,B,H,W), w: (Cin,Cout,k,k) torch layout, b: (Cout,)."""
    Cin, B, H, W = x_cm.shape
    _, Cout, k, _ = w.shape
    # TODO(synk): ~75% of these im2col MACs hit inserted zeros; a sub-pixel
    # (phase) decomposition would cut decoder patch bytes / MXU work ~4x.
    Hd, Wd = (H - 1) * stride + 1, (W - 1) * stride + 1
    x_dil = jnp.zeros((Cin, B, Hd, Wd), x_cm.dtype).at[:, :, ::stride, ::stride].set(x_cm)
    lo = k - 1 - padding
    hi = k - 1 - padding + output_padding
    x_pad = jnp.pad(x_dil, ((0, 0), (0, 0), (lo, hi), (lo, hi)))
    w_conv = w[:, :, ::-1, ::-1].transpose(1, 0, 2, 3)        # (Cout, Cin, k, k)
    patches_t, Ho, Wo = _extract_patches_t(x_pad, k, 1)
    out = matmul_bias_act(w_conv.reshape(Cout, Cin * k * k), patches_t, b, apply_relu)
    return out.reshape(Cout, B, Ho, Wo)


# ----------------------------------------------------------------------------
# Deterministic parameter init (PyTorch-style uniform(-1/sqrt(fan_in), ...))
# ----------------------------------------------------------------------------
def init_params(key, latent_dim, no_channels):
    keys = jax.random.split(key, 20)

    def u(k, shape, fan_in):
        bound = float(fan_in) ** -0.5
        return jax.random.uniform(k, shape, jnp.float32, -bound, bound)

    p = {}
    # encoder
    p["e1_w"] = u(keys[0], (16, no_channels, 3, 3), no_channels * 9)
    p["e1_b"] = u(keys[1], (16,), no_channels * 9)
    p["e2_w"] = u(keys[2], (32, 16, 3, 3), 16 * 9)
    p["e2_b"] = u(keys[3], (32,), 16 * 9)
    p["e3_w"] = u(keys[4], (16, 32, 8, 8), 32 * 64)
    p["e3_b"] = u(keys[5], (16,), 32 * 64)
    p["e4_w"] = u(keys[6], (8, 16, 2, 2), 16 * 4)
    p["e4_b"] = u(keys[7], (8,), 16 * 4)
    p["e5_w"] = u(keys[8], (latent_dim, 8 * 2 * 2), 8 * 2 * 2)
    p["e5_b"] = u(keys[9], (latent_dim,), 8 * 2 * 2)
    # decoder
    p["d1_w"] = u(keys[10], (8 * 2 * 2, latent_dim), latent_dim)
    p["d1_b"] = u(keys[11], (8 * 2 * 2,), latent_dim)
    p["d2_w"] = u(keys[12], (8, 16, 2, 2), 16 * 4)      # ConvTranspose2d(8,16,2)
    p["d2_b"] = u(keys[13], (16,), 16 * 4)
    p["d3_w"] = u(keys[14], (16, 32, 8, 8), 32 * 64)    # ConvTranspose2d(16,32,8)
    p["d3_b"] = u(keys[15], (32,), 32 * 64)
    p["d4_w"] = u(keys[16], (32, 16, 3, 3), 16 * 9)     # ConvTranspose2d(32,16,3)
    p["d4_b"] = u(keys[17], (16,), 16 * 9)
    p["d5_w"] = u(keys[18], (16, no_channels, 3, 3), no_channels * 9)
    p["d5_b"] = u(keys[19], (no_channels,), no_channels * 9)
    return p


# ----------------------------------------------------------------------------
# Forward pass (activation = ReLU, applied after the last layer per the spec)
# ----------------------------------------------------------------------------
def cnn_ae_fmnist_forward(params, x):
    # Channel-major (C, B, H, W) activations throughout: the lane-dense
    # (O, B*Ho*Wo) kernel outputs feed the next im2col without any transpose.
    h = x.transpose(1, 0, 2, 3)
    # --- encoder ---
    h = conv2d_cm(h, params["e1_w"], params["e1_b"], 2, 1, True)    # 32 -> 16
    h = conv2d_cm(h, params["e2_w"], params["e2_b"], 2, 1, True)    # 16 -> 8
    h = conv2d_cm(h, params["e3_w"], params["e3_b"], 2, 1, True)    # 8  -> 2
    h = conv2d_cm(h, params["e4_w"], params["e4_b"], 2, 1, False)   # 2  -> 2
    B = h.shape[1]
    flat_t = h.transpose(0, 2, 3, 1).reshape(8 * 2 * 2, B)  # torch Flatten order, (32, B)
    # --- bottleneck: Linear(32->L) + Linear(L->32) fused in one kernel ---
    h = bottleneck(flat_t, params["e5_w"], params["e5_b"],
                   params["d1_w"], params["d1_b"])
    h = h.reshape(8, 2, 2, B).transpose(0, 3, 1, 2)          # Unflatten -> (8,B,2,2)
    # --- decoder ---
    h = conv_transpose2d_cm(h, params["d2_w"], params["d2_b"], 2, 1, 0, True)   # 2 -> 2
    h = conv_transpose2d_cm(h, params["d3_w"], params["d3_b"], 2, 1, 0, True)   # 2 -> 8
    h = conv_transpose2d_cm(h, params["d4_w"], params["d4_b"], 2, 1, 1, True)   # 8 -> 16
    h = conv_transpose2d_cm(h, params["d5_w"], params["d5_b"], 2, 1, 1, True)   # 16 -> 32
    return h.transpose(1, 0, 2, 3)                           # back to NCHW


if __name__ == "__main__":
    key = jax.random.PRNGKey(0)
    kx, kp = jax.random.split(key)
    latent_dim, no_channels = 16, 1
    # 32x32 spatial is forced by the architecture (Flatten -> Linear(8*2*2)).
    x = jax.random.normal(kx, (2, no_channels, 32, 32), jnp.float32)
    params = init_params(kp, latent_dim, no_channels)

    out = jax.jit(cnn_ae_fmnist_forward)(params, x)
    out = jax.block_until_ready(out)
    assert out.shape == (2, no_channels, 32, 32), out.shape
    assert out.dtype == jnp.float32
    print("KERNEL_OK")
</pallas_src>

<mosaic_0001>
module attributes {stable_mosaic.version = 11 : i64} {
  func.func @_matmul_bias_act_kernel(%arg0: i32, %arg1: memref<16x9xbf16, #tpu.memory_space<vmem>>, %arg2: memref<9x512xbf16, #tpu.memory_space<vmem>>, %arg3: memref<16x1xf32, #tpu.memory_space<vmem>>, %arg4: memref<16x512xf32, #tpu.memory_space<vmem>>) attributes {dimension_semantics = [#tpu.dimension_semantics<parallel>], iteration_bounds = array<i64: 1>, scalar_prefetch = 0 : i64, scratch_operands = 0 : i64, tpu.core_type = #tpu.core_type<tc>, window_params = [{pipeline_mode = #tpu.pipeline_mode<synchronous>, transform_indices = @transform_0, window_bounds = array<i64: 16, 9>}, {transform_indices = @transform_1, window_bounds = array<i64: 9, 512>}, {pipeline_mode = #tpu.pipeline_mode<synchronous>, transform_indices = @transform_2, window_bounds = array<i64: 16, 1>}, {transform_indices = @transform_3, window_bounds = array<i64: 16, 512>}]} {
    %c0 = arith.constant 0 : index
    %c0_0 = arith.constant 0 : index
    %0 = vector.load %arg1[%c0, %c0_0] : memref<16x9xbf16, #tpu.memory_space<vmem>>, vector<16x9xbf16>
    %c0_1 = arith.constant 0 : index
    %c0_2 = arith.constant 0 : index
    %1 = vector.load %arg2[%c0_1, %c0_2] : memref<9x512xbf16, #tpu.memory_space<vmem>>, vector<9x512xbf16>
    %cst = arith.constant dense<0.000000e+00> : vector<16x512xf32>
    %2 = tpu.matmul %0, %1, %cst {dimension_numbers = #tpu.dot_dimension_numbers<[1], [0], [0], [1], [0, 0, 1, 1], [], []>} : vector<16x9xbf16>, vector<9x512xbf16>, vector<16x512xf32> -> vector<16x512xf32>
    %c0_3 = arith.constant 0 : index
    %c0_4 = arith.constant 0 : index
    %3 = vector.load %arg3[%c0_3, %c0_4] : memref<16x1xf32, #tpu.memory_space<vmem>>, vector<16x1xf32>
    %4 = vector.broadcast %3 : vector<16x1xf32> to vector<16x512xf32>
    %5 = arith.addf %2, %4 : vector<16x512xf32>
    %cst_5 = arith.constant 0.000000e+00 : f32
    %6 = vector.broadcast %cst_5 : f32 to vector<16x512xf32>
    %7 = arith.maximumf %5, %6 : vector<16x512xf32>
    %c0_6 = arith.constant 0 : index
    %c0_7 = arith.constant 0 : index
    %8 = vector.load %arg4[%c0_6, %c0_7] : memref<16x512xf32, #tpu.memory_space<vmem>>, vector<16x512xf32>
    tpu.vector_store %arg4[%c0_6, %c0_7], %7 {strides = array<i32>} : memref<16x512xf32, #tpu.memory_space<vmem>>, vector<16x512xf32>,
    return
  }
  func.func @transform_0(%arg0: i32) -> (i32, i32) {
    %c0_i32 = arith.constant 0 : i32
    %c0_i32_0 = arith.constant 0 : i32
    %c0_i32_1 = arith.constant 0 : i32
    return %c0_i32, %c0_i32_0 : i32, i32
  }
  func.func @transform_1(%arg0: i32) -> (i32, i32) {
    %c0_i32 = arith.constant 0 : i32
    %c0_i32_0 = arith.constant 0 : i32
    return %c0_i32, %arg0 : i32, i32
  }
  func.func @transform_2(%arg0: i32) -> (i32, i32) {
    %c0_i32 = arith.constant 0 : i32
    %c0_i32_0 = arith.constant 0 : i32
    %c0_i32_1 = arith.constant 0 : i32
    return %c0_i32, %c0_i32_0 : i32, i32
  }
  func.func @transform_3(%arg0: i32) -> (i32, i32) {
    %c0_i32 = arith.constant 0 : i32
    %c0_i32_0 = arith.constant 0 : i32
    return %c0_i32, %arg0 : i32, i32
  }
}

module attributes {stable_mosaic.version = 11 : i64} {
  func.func @_matmul_bias_act_kernel(%arg0: i32, %arg1: memref<32x144xbf16, #tpu.memory_space<vmem>>, %arg2: memref<144x128xbf16, #tpu.memory_space<vmem>>, %arg3: memref<32x1xf32, #tpu.memory_space<vmem>>, %arg4: memref<32x128xf32, #tpu.memory_space<vmem>>) attributes {dimension_semantics = [#tpu.dimension_semantics<parallel>], iteration_bounds = array<i64: 1>, scalar_prefetch = 0 : i64, scratch_operands = 0 : i64, tpu.core_type = #tpu.core_type<tc>, window_params = [{pipeline_mode = #tpu.pipeline_mode<synchronous>, transform_indices = @transform_0, window_bounds = array<i64: 32, 144>}, {transform_indices = @transform_1, window_bounds = array<i64: 144, 128>}, {pipeline_mode = #tpu.pipeline_mode<synchronous>, transform_indices = @transform_2, window_bounds = array<i64: 32, 1>}, {transform_indices = @transform_3, window_bounds = array<i64: 32, 128>}]} {
    %c0 = arith.constant 0 : index
    %c0_0 = arith.constant 0 : index
    %0 = vector.load %arg1[%c0, %c0_0] : memref<32x144xbf16, #tpu.memory_space<vmem>>, vector<32x144xbf16>
    %c0_1 = arith.constant 0 : index
    %c0_2 = arith.constant 0 : index
    %1 = vector.load %arg2[%c0_1, %c0_2] : memref<144x128xbf16, #tpu.memory_space<vmem>>, vector<144x128xbf16>
    %cst = arith.constant dense<0.000000e+00> : vector<32x128xf32>
    %2 = tpu.matmul %0, %1, %cst {dimension_numbers = #tpu.dot_dimension_numbers<[1], [0], [0], [1], [0, 0, 1, 1], [], []>} : vector<32x144xbf16>, vector<144x128xbf16>, vector<32x128xf32> -> vector<32x128xf32>
    %c0_3 = arith.constant 0 : index
    %c0_4 = arith.constant 0 : index
    %3 = vector.load %arg3[%c0_3, %c0_4] : memref<32x1xf32, #tpu.memory_space<vmem>>, vector<32x1xf32>
    %4 = vector.broadcast %3 : vector<32x1xf32> to vector<32x128xf32>
    %5 = arith.addf %2, %4 : vector<32x128xf32>
    %cst_5 = arith.constant 0.000000e+00 : f32
    %6 = vector.broadcast %cst_5 : f32 to vector<32x128xf32>
    %7 = arith.maximumf %5, %6 : vector<32x128xf32>
    %c0_6 = arith.constant 0 : index
    %c0_7 = arith.constant 0 : index
    %8 = vector.load %arg4[%c0_6, %c0_7] : memref<32x128xf32, #tpu.memory_space<vmem>>, vector<32x128xf32>
    tpu.vector_store %arg4[%c0_6, %c0_7], %7 {strides = array<i32>} : memref<32x128xf32, #tpu.memory_space<vmem>>, vector<32x128xf32>,
    return
  }
  func.func @transform_0(%arg0: i32) -> (i32, i32) {
    %c0_i32 = arith.constant 0 : i32
    %c0_i32_0 = arith.constant 0 : i32
    %c0_i32_1 = arith.constant 0 : i32
    return %c0_i32, %c0_i32_0 : i32, i32
  }
  func.func @transform_1(%arg0: i32) -> (i32, i32) {
    %c0_i32 = arith.constant 0 : i32
    %c0_i32_0 = arith.constant 0 : i32
    return %c0_i32, %arg0 : i32, i32
  }
  func.func @transform_2(%arg0: i32) -> (i32, i32) {
    %c0_i32 = arith.constant 0 : i32
    %c0_i32_0 = arith.constant 0 : i32
    %c0_i32_1 = arith.constant 0 : i32
    return %c0_i32, %c0_i32_0 : i32, i32
  }
  func.func @transform_3(%arg0: i32) -> (i32, i32) {
    %c0_i32 = arith.constant 0 : i32
    %c0_i32_0 = arith.constant 0 : i32
    return %c0_i32, %arg0 : i32, i32
  }
}

module attributes {stable_mosaic.version = 11 : i64} {
  func.func @_matmul_bias_act_kernel(%arg0: i32, %arg1: memref<16x2048xbf16, #tpu.memory_space<vmem>>, %arg2: memref<2048x8xbf16, #tpu.memory_space<vmem>>, %arg3: memref<16x1xf32, #tpu.memory_space<vmem>>, %arg4: memref<16x8xf32, #tpu.memory_space<vmem>>) attributes {dimension_semantics = [#tpu.dimension_semantics<parallel>], iteration_bounds = array<i64: 1>, scalar_prefetch = 0 : i64, scratch_operands = 0 : i64, tpu.core_type = #tpu.core_type<tc>, window_params = [{pipeline_mode = #tpu.pipeline_mode<synchronous>, transform_indices = @transform_0, window_bounds = array<i64: 16, 2048>}, {transform_indices = @transform_1, window_bounds = array<i64: 2048, 8>}, {pipeline_mode = #tpu.pipeline_mode<synchronous>, transform_indices = @transform_2, window_bounds = array<i64: 16, 1>}, {transform_indices = @transform_3, window_bounds = array<i64: 16, 8>}]} {
    %c0 = arith.constant 0 : index
    %c0_0 = arith.constant 0 : index
    %0 = vector.load %arg1[%c0, %c0_0] : memref<16x2048xbf16, #tpu.memory_space<vmem>>, vector<16x2048xbf16>
    %c0_1 = arith.constant 0 : index
    %c0_2 = arith.constant 0 : index
    %1 = vector.load %arg2[%c0_1, %c0_2] : memref<2048x8xbf16, #tpu.memory_space<vmem>>, vector<2048x8xbf16>
    %cst = arith.constant dense<0.000000e+00> : vector<16x8xf32>
    %2 = tpu.matmul %0, %1, %cst {dimension_numbers = #tpu.dot_dimension_numbers<[1], [0], [0], [1], [0, 0, 1, 1], [], []>} : vector<16x2048xbf16>, vector<2048x8xbf16>, vector<16x8xf32> -> vector<16x8xf32>
    %c0_3 = arith.constant 0 : index
    %c0_4 = arith.constant 0 : index
    %3 = vector.load %arg3[%c0_3, %c0_4] : memref<16x1xf32, #tpu.memory_space<vmem>>, vector<16x1xf32>
    %4 = vector.broadcast %3 : vector<16x1xf32> to vector<16x8xf32>
    %5 = arith.addf %2, %4 : vector<16x8xf32>
    %cst_5 = arith.constant 0.000000e+00 : f32
    %6 = vector.broadcast %cst_5 : f32 to vector<16x8xf32>
    %7 = arith.maximumf %5, %6 : vector<16x8xf32>
    %c0_6 = arith.constant 0 : index
    %c0_7 = arith.constant 0 : index
    %8 = vector.load %arg4[%c0_6, %c0_7] : memref<16x8xf32, #tpu.memory_space<vmem>>, vector<16x8xf32>
    tpu.vector_store %arg4[%c0_6, %c0_7], %7 {strides = array<i32>} : memref<16x8xf32, #tpu.memory_space<vmem>>, vector<16x8xf32>,
    return
  }
  func.func @transform_0(%arg0: i32) -> (i32, i32) {
    %c0_i32 = arith.constant 0 : i32
    %c0_i32_0 = arith.constant 0 : i32
    %c0_i32_1 = arith.constant 0 : i32
    return %c0_i32, %c0_i32_0 : i32, i32
  }
  func.func @transform_1(%arg0: i32) -> (i32, i32) {
    %c0_i32 = arith.constant 0 : i32
    %c0_i32_0 = arith.constant 0 : i32
    return %c0_i32, %arg0 : i32, i32
  }
  func.func @transform_2(%arg0: i32) -> (i32, i32) {
    %c0_i32 = arith.constant 0 : i32
    %c0_i32_0 = arith.constant 0 : i32
    %c0_i32_1 = arith.constant 0 : i32
    return %c0_i32, %c0_i32_0 : i32, i32
  }
  func.func @transform_3(%arg0: i32) -> (i32, i32) {
    %c0_i32 = arith.constant 0 : i32
    %c0_i32_0 = arith.constant 0 : i32
    return %c0_i32, %arg0 : i32, i32
  }
}

module attributes {stable_mosaic.version = 11 : i64} {
  func.func @_matmul_bias_act_kernel(%arg0: i32, %arg1: memref<8x64xbf16, #tpu.memory_space<vmem>>, %arg2: memref<64x8xbf16, #tpu.memory_space<vmem>>, %arg3: memref<8x1xf32, #tpu.memory_space<vmem>>, %arg4: memref<8x8xf32, #tpu.memory_space<vmem>>) attributes {dimension_semantics = [#tpu.dimension_semantics<parallel>], iteration_bounds = array<i64: 1>, scalar_prefetch = 0 : i64, scratch_operands = 0 : i64, tpu.core_type = #tpu.core_type<tc>, window_params = [{pipeline_mode = #tpu.pipeline_mode<synchronous>, transform_indices = @transform_0, window_bounds = array<i64: 8, 64>}, {transform_indices = @transform_1, window_bounds = array<i64: 64, 8>}, {pipeline_mode = #tpu.pipeline_mode<synchronous>, transform_indices = @transform_2, window_bounds = array<i64: 8, 1>}, {transform_indices = @transform_3, window_bounds = array<i64: 8, 8>}]} {
    %c0 = arith.constant 0 : index
    %c0_0 = arith.constant 0 : index
    %0 = vector.load %arg1[%c0, %c0_0] : memref<8x64xbf16, #tpu.memory_space<vmem>>, vector<8x64xbf16>
    %c0_1 = arith.constant 0 : index
    %c0_2 = arith.constant 0 : index
    %1 = vector.load %arg2[%c0_1, %c0_2] : memref<64x8xbf16, #tpu.memory_space<vmem>>, vector<64x8xbf16>
    %cst = arith.constant dense<0.000000e+00> : vector<8x8xf32>
    %2 = tpu.matmul %0, %1, %cst {dimension_numbers = #tpu.dot_dimension_numbers<[1], [0], [0], [1], [0, 0, 1, 1], [], []>} : vector<8x64xbf16>, vector<64x8xbf16>, vector<8x8xf32> -> vector<8x8xf32>
    %c0_3 = arith.constant 0 : index
    %c0_4 = arith.constant 0 : index
    %3 = vector.load %arg3[%c0_3, %c0_4] : memref<8x1xf32, #tpu.memory_space<vmem>>, vector<8x1xf32>
    %4 = vector.broadcast %3 : vector<8x1xf32> to vector<8x8xf32>
    %5 = arith.addf %2, %4 : vector<8x8xf32>
    %c0_5 = arith.constant 0 : index
    %c0_6 = arith.constant 0 : index
    %6 = vector.load %arg4[%c0_5, %c0_6] : memref<8x8xf32, #tpu.memory_space<vmem>>, vector<8x8xf32>
    tpu.vector_store %arg4[%c0_5, %c0_6], %5 {strides = array<i32>} : memref<8x8xf32, #tpu.memory_space<vmem>>, vector<8x8xf32>,
    return
  }
  func.func @transform_0(%arg0: i32) -> (i32, i32) {
    %c0_i32 = arith.constant 0 : i32
    %c0_i32_0 = arith.constant 0 : i32
    %c0_i32_1 = arith.constant 0 : i32
    return %c0_i32, %c0_i32_0 : i32, i32
  }
  func.func @transform_1(%arg0: i32) -> (i32, i32) {
    %c0_i32 = arith.constant 0 : i32
    %c0_i32_0 = arith.constant 0 : i32
    return %c0_i32, %arg0 : i32, i32
  }
  func.func @transform_2(%arg0: i32) -> (i32, i32) {
    %c0_i32 = arith.constant 0 : i32
    %c0_i32_0 = arith.constant 0 : i32
    %c0_i32_1 = arith.constant 0 : i32
    return %c0_i32, %c0_i32_0 : i32, i32
  }
  func.func @transform_3(%arg0: i32) -> (i32, i32) {
    %c0_i32 = arith.constant 0 : i32
    %c0_i32_0 = arith.constant 0 : i32
    return %c0_i32, %arg0 : i32, i32
  }
}

module attributes {stable_mosaic.version = 11 : i64} {
  func.func @_bottleneck_kernel(%arg0: i32, %arg1: memref<32x2xf32, #tpu.memory_space<vmem>>, %arg2: memref<16x32xf32, #tpu.memory_space<vmem>>, %arg3: memref<16x1xf32, #tpu.memory_space<vmem>>, %arg4: memref<32x16xf32, #tpu.memory_space<vmem>>, %arg5: memref<32x1xf32, #tpu.memory_space<vmem>>, %arg6: memref<32x2xf32, #tpu.memory_space<vmem>>) attributes {dimension_semantics = [#tpu.dimension_semantics<arbitrary>], iteration_bounds = array<i64: 1>, scalar_prefetch = 0 : i64, scratch_operands = 0 : i64, tpu.core_type = #tpu.core_type<tc>, window_params = [{pipeline_mode = #tpu.pipeline_mode<synchronous>, transform_indices = @transform_0, window_bounds = array<i64: 32, 2>}, {pipeline_mode = #tpu.pipeline_mode<synchronous>, transform_indices = @transform_1, window_bounds = array<i64: 16, 32>}, {pipeline_mode = #tpu.pipeline_mode<synchronous>, transform_indices = @transform_2, window_bounds = array<i64: 16, 1>}, {pipeline_mode = #tpu.pipeline_mode<synchronous>, transform_indices = @transform_3, window_bounds = array<i64: 32, 16>}, {pipeline_mode = #tpu.pipeline_mode<synchronous>, transform_indices = @transform_4, window_bounds = array<i64: 32, 1>}, {pipeline_mode = #tpu.pipeline_mode<synchronous>, transform_indices = @transform_5, window_bounds = array<i64: 32, 2>}]} {
    %c0 = arith.constant 0 : index
    %c0_0 = arith.constant 0 : index
    %0 = vector.load %arg2[%c0, %c0_0] : memref<16x32xf32, #tpu.memory_space<vmem>>, vector<16x32xf32>
    %c0_1 = arith.constant 0 : index
    %c0_2 = arith.constant 0 : index
    %1 = vector.load %arg1[%c0_1, %c0_2] : memref<32x2xf32, #tpu.memory_space<vmem>>, vector<32x2xf32>
    %cst = arith.constant dense<0.000000e+00> : vector<16x2xf32>
    %2 = tpu.matmul %0, %1, %cst {dimension_numbers = #tpu.dot_dimension_numbers<[1], [0], [0], [1], [0, 0, 1, 1], [], []>} : vector<16x32xf32>, vector<32x2xf32>, vector<16x2xf32> -> vector<16x2xf32>
    %c0_3 = arith.constant 0 : index
    %c0_4 = arith.constant 0 : index
    %3 = vector.load %arg3[%c0_3, %c0_4] : memref<16x1xf32, #tpu.memory_space<vmem>>, vector<16x1xf32>
    %4 = vector.broadcast %3 : vector<16x1xf32> to vector<16x2xf32>
    %5 = arith.addf %2, %4 : vector<16x2xf32>
    %c0_5 = arith.constant 0 : index
    %c0_6 = arith.constant 0 : index
    %6 = vector.load %arg4[%c0_5, %c0_6] : memref<32x16xf32, #tpu.memory_space<vmem>>, vector<32x16xf32>
    %cst_7 = arith.constant dense<0.000000e+00> : vector<32x2xf32>
    %7 = tpu.matmul %6, %5, %cst_7 {dimension_numbers = #tpu.dot_dimension_numbers<[1], [0], [0], [1], [0, 0, 1, 1], [], []>} : vector<32x16xf32>, vector<16x2xf32>, vector<32x2xf32> -> vector<32x2xf32>
    %c0_8 = arith.constant 0 : index
    %c0_9 = arith.constant 0 : index
    %8 = vector.load %arg5[%c0_8, %c0_9] : memref<32x1xf32, #tpu.memory_space<vmem>>, vector<32x1xf32>
    %9 = vector.broadcast %8 : vector<32x1xf32> to vector<32x2xf32>
    %10 = arith.addf %7, %9 : vector<32x2xf32>
    %c0_10 = arith.constant 0 : index
    %c0_11 = arith.constant 0 : index
    %11 = vector.load %arg6[%c0_10, %c0_11] : memref<32x2xf32, #tpu.memory_space<vmem>>, vector<32x2xf32>
    tpu.vector_store %arg6[%c0_10, %c0_11], %10 {strides = array<i32>} : memref<32x2xf32, #tpu.memory_space<vmem>>, vector<32x2xf32>,
    return
  }
  func.func @transform_0(%arg0: i32) -> (i32, i32) {
    %c0_i32 = arith.constant 0 : i32
    %c0_i32_0 = arith.constant 0 : i32
    %c0_i32_1 = arith.constant 0 : i32
    return %c0_i32, %c0_i32_0 : i32, i32
  }
  func.func @transform_1(%arg0: i32) -> (i32, i32) {
    %c0_i32 = arith.constant 0 : i32
    %c0_i32_0 = arith.constant 0 : i32
    %c0_i32_1 = arith.constant 0 : i32
    return %c0_i32, %c0_i32_0 : i32, i32
  }
  func.func @transform_2(%arg0: i32) -> (i32, i32) {
    %c0_i32 = arith.constant 0 : i32
    %c0_i32_0 = arith.constant 0 : i32
    %c0_i32_1 = arith.constant 0 : i32
    return %c0_i32, %c0_i32_0 : i32, i32
  }
  func.func @transform_3(%arg0: i32) -> (i32, i32) {
    %c0_i32 = arith.constant 0 : i32
    %c0_i32_0 = arith.constant 0 : i32
    %c0_i32_1 = arith.constant 0 : i32
    return %c0_i32, %c0_i32_0 : i32, i32
  }
  func.func @transform_4(%arg0: i32) -> (i32, i32) {
    %c0_i32 = arith.constant 0 : i32
    %c0_i32_0 = arith.constant 0 : i32
    %c0_i32_1 = arith.constant 0 : i32
    return %c0_i32, %c0_i32_0 : i32, i32
  }
  func.func @transform_5(%arg0: i32) -> (i32, i32) {
    %c0_i32 = arith.constant 0 : i32
    %c0_i32_0 = arith.constant 0 : i32
    %c0_i32_1 = arith.constant 0 : i32
    return %c0_i32, %c0_i32_0 : i32, i32
  }
}

module attributes {stable_mosaic.version = 11 : i64} {
  func.func @_matmul_bias_act_kernel(%arg0: i32, %arg1: memref<16x32xbf16, #tpu.memory_space<vmem>>, %arg2: memref<32x8xbf16, #tpu.memory_space<vmem>>, %arg3: memref<16x1xf32, #tpu.memory_space<vmem>>, %arg4: memref<16x8xf32, #tpu.memory_space<vmem>>) attributes {dimension_semantics = [#tpu.dimension_semantics<parallel>], iteration_bounds = array<i64: 1>, scalar_prefetch = 0 : i64, scratch_operands = 0 : i64, tpu.core_type = #tpu.core_type<tc>, window_params = [{pipeline_mode = #tpu.pipeline_mode<synchronous>, transform_indices = @transform_0, window_bounds = array<i64: 16, 32>}, {transform_indices = @transform_1, window_bounds = array<i64: 32, 8>}, {pipeline_mode = #tpu.pipeline_mode<synchronous>, transform_indices = @transform_2, window_bounds = array<i64: 16, 1>}, {transform_indices = @transform_3, window_bounds = array<i64: 16, 8>}]} {
    %c0 = arith.constant 0 : index
    %c0_0 = arith.constant 0 : index
    %0 = vector.load %arg1[%c0, %c0_0] : memref<16x32xbf16, #tpu.memory_space<vmem>>, vector<16x32xbf16>
    %c0_1 = arith.constant 0 : index
    %c0_2 = arith.constant 0 : index
    %1 = vector.load %arg2[%c0_1, %c0_2] : memref<32x8xbf16, #tpu.memory_space<vmem>>, vector<32x8xbf16>
    %cst = arith.constant dense<0.000000e+00> : vector<16x8xf32>
    %2 = tpu.matmul %0, %1, %cst {dimension_numbers = #tpu.dot_dimension_numbers<[1], [0], [0], [1], [0, 0, 1, 1], [], []>} : vector<16x32xbf16>, vector<32x8xbf16>, vector<16x8xf32> -> vector<16x8xf32>
    %c0_3 = arith.constant 0 : index
    %c0_4 = arith.constant 0 : index
    %3 = vector.load %arg3[%c0_3, %c0_4] : memref<16x1xf32, #tpu.memory_space<vmem>>, vector<16x1xf32>
    %4 = vector.broadcast %3 : vector<16x1xf32> to vector<16x8xf32>
    %5 = arith.addf %2, %4 : vector<16x8xf32>
    %cst_5 = arith.constant 0.000000e+00 : f32
    %6 = vector.broadcast %cst_5 : f32 to vector<16x8xf32>
    %7 = arith.maximumf %5, %6 : vector<16x8xf32>
    %c0_6 = arith.constant 0 : index
    %c0_7 = arith.constant 0 : index
    %8 = vector.load %arg4[%c0_6, %c0_7] : memref<16x8xf32, #tpu.memory_space<vmem>>, vector<16x8xf32>
    tpu.vector_store %arg4[%c0_6, %c0_7], %7 {strides = array<i32>} : memref<16x8xf32, #tpu.memory_space<vmem>>, vector<16x8xf32>,
    return
  }
  func.func @transform_0(%arg0: i32) -> (i32, i32) {
    %c0_i32 = arith.constant 0 : i32
    %c0_i32_0 = arith.constant 0 : i32
    %c0_i32_1 = arith.constant 0 : i32
    return %c0_i32, %c0_i32_0 : i32, i32
  }
  func.func @transform_1(%arg0: i32) -> (i32, i32) {
    %c0_i32 = arith.constant 0 : i32
    %c0_i32_0 = arith.constant 0 : i32
    return %c0_i32, %arg0 : i32, i32
  }
  func.func @transform_2(%arg0: i32) -> (i32, i32) {
    %c0_i32 = arith.constant 0 : i32
    %c0_i32_0 = arith.constant 0 : i32
    %c0_i32_1 = arith.constant 0 : i32
    return %c0_i32, %c0_i32_0 : i32, i32
  }
  func.func @transform_3(%arg0: i32) -> (i32, i32) {
    %c0_i32 = arith.constant 0 : i32
    %c0_i32_0 = arith.constant 0 : i32
    return %c0_i32, %arg0 : i32, i32
  }
}

module attributes {stable_mosaic.version = 11 : i64} {
  func.func @_matmul_bias_act_kernel(%arg0: i32, %arg1: memref<32x1024xbf16, #tpu.memory_space<vmem>>, %arg2: memref<1024x128xbf16, #tpu.memory_space<vmem>>, %arg3: memref<32x1xf32, #tpu.memory_space<vmem>>, %arg4: memref<32x128xf32, #tpu.memory_space<vmem>>) attributes {dimension_semantics = [#tpu.dimension_semantics<parallel>], iteration_bounds = array<i64: 1>, scalar_prefetch = 0 : i64, scratch_operands = 0 : i64, tpu.core_type = #tpu.core_type<tc>, window_params = [{pipeline_mode = #tpu.pipeline_mode<synchronous>, transform_indices = @transform_0, window_bounds = array<i64: 32, 1024>}, {transform_indices = @transform_1, window_bounds = array<i64: 1024, 128>}, {pipeline_mode = #tpu.pipeline_mode<synchronous>, transform_indices = @transform_2, window_bounds = array<i64: 32, 1>}, {transform_indices = @transform_3, window_bounds = array<i64: 32, 128>}]} {
    %c0 = arith.constant 0 : index
    %c0_0 = arith.constant 0 : index
    %0 = vector.load %arg1[%c0, %c0_0] : memref<32x1024xbf16, #tpu.memory_space<vmem>>, vector<32x1024xbf16>
    %c0_1 = arith.constant 0 : index
    %c0_2 = arith.constant 0 : index
    %1 = vector.load %arg2[%c0_1, %c0_2] : memref<1024x128xbf16, #tpu.memory_space<vmem>>, vector<1024x128xbf16>
    %cst = arith.constant dense<0.000000e+00> : vector<32x128xf32>
    %2 = tpu.matmul %0, %1, %cst {dimension_numbers = #tpu.dot_dimension_numbers<[1], [0], [0], [1], [0, 0, 1, 1], [], []>} : vector<32x1024xbf16>, vector<1024x128xbf16>, vector<32x128xf32> -> vector<32x128xf32>
    %c0_3 = arith.constant 0 : index
    %c0_4 = arith.constant 0 : index
    %3 = vector.load %arg3[%c0_3, %c0_4] : memref<32x1xf32, #tpu.memory_space<vmem>>, vector<32x1xf32>
    %4 = vector.broadcast %3 : vector<32x1xf32> to vector<32x128xf32>
    %5 = arith.addf %2, %4 : vector<32x128xf32>
    %cst_5 = arith.constant 0.000000e+00 : f32
    %6 = vector.broadcast %cst_5 : f32 to vector<32x128xf32>
    %7 = arith.maximumf %5, %6 : vector<32x128xf32>
    %c0_6 = arith.constant 0 : index
    %c0_7 = arith.constant 0 : index
    %8 = vector.load %arg4[%c0_6, %c0_7] : memref<32x128xf32, #tpu.memory_space<vmem>>, vector<32x128xf32>
    tpu.vector_store %arg4[%c0_6, %c0_7], %7 {strides = array<i32>} : memref<32x128xf32, #tpu.memory_space<vmem>>, vector<32x128xf32>,
    return
  }
  func.func @transform_0(%arg0: i32) -> (i32, i32) {
    %c0_i32 = arith.constant 0 : i32
    %c0_i32_0 = arith.constant 0 : i32
    %c0_i32_1 = arith.constant 0 : i32
    return %c0_i32, %c0_i32_0 : i32, i32
  }
  func.func @transform_1(%arg0: i32) -> (i32, i32) {
    %c0_i32 = arith.constant 0 : i32
    %c0_i32_0 = arith.constant 0 : i32
    return %c0_i32, %arg0 : i32, i32
  }
  func.func @transform_2(%arg0: i32) -> (i32, i32) {
    %c0_i32 = arith.constant 0 : i32
    %c0_i32_0 = arith.constant 0 : i32
    %c0_i32_1 = arith.constant 0 : i32
    return %c0_i32, %c0_i32_0 : i32, i32
  }
  func.func @transform_3(%arg0: i32) -> (i32, i32) {
    %c0_i32 = arith.constant 0 : i32
    %c0_i32_0 = arith.constant 0 : i32
    return %c0_i32, %arg0 : i32, i32
  }
}

module attributes {stable_mosaic.version = 11 : i64} {
  func.func @_matmul_bias_act_kernel(%arg0: i32, %arg1: memref<16x288xbf16, #tpu.memory_space<vmem>>, %arg2: memref<288x512xbf16, #tpu.memory_space<vmem>>, %arg3: memref<16x1xf32, #tpu.memory_space<vmem>>, %arg4: memref<16x512xf32, #tpu.memory_space<vmem>>) attributes {dimension_semantics = [#tpu.dimension_semantics<parallel>], iteration_bounds = array<i64: 1>, scalar_prefetch = 0 : i64, scratch_operands = 0 : i64, tpu.core_type = #tpu.core_type<tc>, window_params = [{pipeline_mode = #tpu.pipeline_mode<synchronous>, transform_indices = @transform_0, window_bounds = array<i64: 16, 288>}, {transform_indices = @transform_1, window_bounds = array<i64: 288, 512>}, {pipeline_mode = #tpu.pipeline_mode<synchronous>, transform_indices = @transform_2, window_bounds = array<i64: 16, 1>}, {transform_indices = @transform_3, window_bounds = array<i64: 16, 512>}]} {
    %c0 = arith.constant 0 : index
    %c0_0 = arith.constant 0 : index
    %0 = vector.load %arg1[%c0, %c0_0] : memref<16x288xbf16, #tpu.memory_space<vmem>>, vector<16x288xbf16>
    %c0_1 = arith.constant 0 : index
    %c0_2 = arith.constant 0 : index
    %1 = vector.load %arg2[%c0_1, %c0_2] : memref<288x512xbf16, #tpu.memory_space<vmem>>, vector<288x512xbf16>
    %cst = arith.constant dense<0.000000e+00> : vector<16x512xf32>
    %2 = tpu.matmul %0, %1, %cst {dimension_numbers = #tpu.dot_dimension_numbers<[1], [0], [0], [1], [0, 0, 1, 1], [], []>} : vector<16x288xbf16>, vector<288x512xbf16>, vector<16x512xf32> -> vector<16x512xf32>
    %c0_3 = arith.constant 0 : index
    %c0_4 = arith.constant 0 : index
    %3 = vector.load %arg3[%c0_3, %c0_4] : memref<16x1xf32, #tpu.memory_space<vmem>>, vector<16x1xf32>
    %4 = vector.broadcast %3 : vector<16x1xf32> to vector<16x512xf32>
    %5 = arith.addf %2, %4 : vector<16x512xf32>
    %cst_5 = arith.constant 0.000000e+00 : f32
    %6 = vector.broadcast %cst_5 : f32 to vector<16x512xf32>
    %7 = arith.maximumf %5, %6 : vector<16x512xf32>
    %c0_6 = arith.constant 0 : index
    %c0_7 = arith.constant 0 : index
    %8 = vector.load %arg4[%c0_6, %c0_7] : memref<16x512xf32, #tpu.memory_space<vmem>>, vector<16x512xf32>
    tpu.vector_store %arg4[%c0_6, %c0_7], %7 {strides = array<i32>} : memref<16x512xf32, #tpu.memory_space<vmem>>, vector<16x512xf32>,
    return
  }
  func.func @transform_0(%arg0: i32) -> (i32, i32) {
    %c0_i32 = arith.constant 0 : i32
    %c0_i32_0 = arith.constant 0 : i32
    %c0_i32_1 = arith.constant 0 : i32
    return %c0_i32, %c0_i32_0 : i32, i32
  }
  func.func @transform_1(%arg0: i32) -> (i32, i32) {
    %c0_i32 = arith.constant 0 : i32
    %c0_i32_0 = arith.constant 0 : i32
    return %c0_i32, %arg0 : i32, i32
  }
  func.func @transform_2(%arg0: i32) -> (i32, i32) {
    %c0_i32 = arith.constant 0 : i32
    %c0_i32_0 = arith.constant 0 : i32
    %c0_i32_1 = arith.constant 0 : i32
    return %c0_i32, %c0_i32_0 : i32, i32
  }
  func.func @transform_3(%arg0: i32) -> (i32, i32) {
    %c0_i32 = arith.constant 0 : i32
    %c0_i32_0 = arith.constant 0 : i32
    return %c0_i32, %arg0 : i32, i32
  }
}

module attributes {stable_mosaic.version = 11 : i64} {
  func.func @_matmul_bias_act_kernel(%arg0: i32, %arg1: memref<1x144xbf16, #tpu.memory_space<vmem>>, %arg2: memref<144x512xbf16, #tpu.memory_space<vmem>>, %arg3: memref<1x1xf32, #tpu.memory_space<vmem>>, %arg4: memref<1x512xf32, #tpu.memory_space<vmem>>) attributes {dimension_semantics = [#tpu.dimension_semantics<parallel>], iteration_bounds = array<i64: 4>, scalar_prefetch = 0 : i64, scratch_operands = 0 : i64, tpu.core_type = #tpu.core_type<tc>, window_params = [{pipeline_mode = #tpu.pipeline_mode<synchronous>, transform_indices = @transform_0, window_bounds = array<i64: 1, 144>}, {transform_indices = @transform_1, window_bounds = array<i64: 144, 512>}, {pipeline_mode = #tpu.pipeline_mode<synchronous>, transform_indices = @transform_2, window_bounds = array<i64: 1, 1>}, {transform_indices = @transform_3, window_bounds = array<i64: 1, 512>}]} {
    %c0 = arith.constant 0 : index
    %c0_0 = arith.constant 0 : index
    %0 = vector.load %arg1[%c0, %c0_0] : memref<1x144xbf16, #tpu.memory_space<vmem>>, vector<1x144xbf16>
    %c0_1 = arith.constant 0 : index
    %c0_2 = arith.constant 0 : index
    %1 = vector.load %arg2[%c0_1, %c0_2] : memref<144x512xbf16, #tpu.memory_space<vmem>>, vector<144x512xbf16>
    %cst = arith.constant dense<0.000000e+00> : vector<1x512xf32>
    %2 = tpu.matmul %0, %1, %cst {dimension_numbers = #tpu.dot_dimension_numbers<[1], [0], [0], [1], [0, 0, 1, 1], [], []>} : vector<1x144xbf16>, vector<144x512xbf16>, vector<1x512xf32> -> vector<1x512xf32>
    %c0_3 = arith.constant 0 : index
    %c0_4 = arith.constant 0 : index
    %3 = vector.load %arg3[%c0_3, %c0_4] : memref<1x1xf32, #tpu.memory_space<vmem>>, vector<1x1xf32>
    %4 = vector.broadcast %3 : vector<1x1xf32> to vector<1x512xf32>
    %5 = arith.addf %2, %4 : vector<1x512xf32>
    %cst_5 = arith.constant 0.000000e+00 : f32
    %6 = vector.broadcast %cst_5 : f32 to vector<1x512xf32>
    %7 = arith.maximumf %5, %6 : vector<1x512xf32>
    %c0_6 = arith.constant 0 : index
    %c0_7 = arith.constant 0 : index
    %8 = vector.load %arg4[%c0_6, %c0_7] : memref<1x512xf32, #tpu.memory_space<vmem>>, vector<1x512xf32>
    tpu.vector_store %arg4[%c0_6, %c0_7], %7 {strides = array<i32>} : memref<1x512xf32, #tpu.memory_space<vmem>>, vector<1x512xf32>,
    return
  }
  func.func @transform_0(%arg0: i32) -> (i32, i32) {
    %c0_i32 = arith.constant 0 : i32
    %c0_i32_0 = arith.constant 0 : i32
    %c0_i32_1 = arith.constant 0 : i32
    return %c0_i32, %c0_i32_0 : i32, i32
  }
  func.func @transform_1(%arg0: i32) -> (i32, i32) {
    %c0_i32 = arith.constant 0 : i32
    %c0_i32_0 = arith.constant 0 : i32
    return %c0_i32, %arg0 : i32, i32
  }
  func.func @transform_2(%arg0: i32) -> (i32, i32) {
    %c0_i32 = arith.constant 0 : i32
    %c0_i32_0 = arith.constant 0 : i32
    %c0_i32_1 = arith.constant 0 : i32
    return %c0_i32, %c0_i32_0 : i32, i32
  }
  func.func @transform_3(%arg0: i32) -> (i32, i32) {
    %c0_i32 = arith.constant 0 : i32
    %c0_i32_0 = arith.constant 0 : i32
    return %c0_i32, %arg0 : i32, i32
  }
}

</mosaic_0001>

<bundles_post_ra>
// kernel: cnn_ae_fmnist_forward.9
= control target key start
LH: loop header
LB: loop body
LE: loop exit
PB: predicated region body
PF: predicated region fallthrough
CT: control target
= control target key end

     0   :  { %vm58_vm0 = vcmask 1043456   ;;  %vm59_vm1 = vcmask 1044480   ;;  %v197_v1 = vmov 0   ;;  %v198_v2 = vmov 65535   ;;  %s264_s1 = inlined_call_operand.vmem [shape: bf16[9,512], index: 1, kind: input, shape index: {}]   ;;  %s265_s0 = inlined_call_operand.vmem [shape: bf16[16,9], index: 0, kind: input, shape index: {}]   ;;  %s266_s2 = inlined_call_operand.vmem [shape: f32[16,1], index: 2, kind: input, shape index: {}]   ;;  %s267_s3 = inlined_call_operand.vmem [shape: f32[16,512], index: 3, kind: output, shape index: {}]  }
   0x1   :  { %v190_v0 = vld [vmem:[%s264_s1 + $0x4] ss:$16 sps:$4 sm:$0x1f]   ;;  %106 = vmatprep.mubr.bf16.mxu0 %v197_v1  ;;  %149 = vmatprep.mubr.bf16.mxu1 %v197_v1  ;;  %v60_v3 = vsel %vm58_vm0, 4294967295, %v198_v2  ;;  %v22_v14 = vld [vmem:[%s266_s2 + $0x8] sm:$0xff]  ;;  %vm54_vm2 = vcmask 72704  }
   0x2   :  { %189 = vset.pattern.permute.xlu0 %v197_v1  ;;  %v61_v4 = vsel %vm59_vm1, %v60_v3, 0  ;;  %v192_v5 = vld [vmem:[%s264_s1 + $0xc] ss:$16 sps:$4 sm:$0x1f]   ;;  %v21_v10 = vld [vmem:[%s266_s2] sm:$0xff] }
   0x3   :  { %v66_v6 = vand.u32 %v190_v0, %v61_v4  ;;  %v194_v7 = vld [vmem:[%s264_s1] ss:$16 sps:$4 sm:$0x1f]   ;;  %v195_v8 = vld [vmem:[%s264_s1 + $0x8] ss:$16 sps:$4 sm:$0x1f]   ;;  %v72_v9 = vand.u32 %v192_v5, %v61_v4  ;;  %25 = vperm.xlu0 %189, %v21_v10  }
   0x4   :  { %v63_v11 = vand.u32 %v194_v7, %v61_v4  ;;  %v69_v12 = vand.u32 %v195_v8, %v61_v4  ;;  %v196_v13 = vld [vmem:[%s265_s0] sm:$0xff]  }
   0x5   :  { %88 = vmatprep.subr.bf16.mxu0 %v66_v6  ;;  %131 = vmatprep.subr.bf16.mxu1 %v72_v9 }
   0x6   :  { %89 = vmatpush1.bf16.msra.mxu0 %v63_v11  ;;  %132 = vmatpush1.bf16.msra.mxu1 %v69_v12 }
   0x7   :  { %30 = vperm.xlu0 %189, %v22_v14  }
   0x9   :  { %185 = vmatmul.mubr.msk.bf16.vlgmr.msra.gmra.mxu0 %vm54_vm2, %v196_v13  ;;  %186 = vmatmul.mubr.msk.bf16.vlgmr.msra.gmra.mxu1 %vm54_vm2, %v196_v13 }
  0x7e   :  { %v26_v15 = vpop.permute.xlu0 %25 }
  0x82   :  { %v31_v24 = vpop.permute.xlu0 %30 }
  0xc9   :  { %v108_v16 = vpop.f32.mrf.mxu0  ;;  %v151_v17 = vpop.f32.mrf.mxu1 }
  0xca   :  { %v109_v18 = vadd.f32 %v108_v16, %v26_v15  ;;  %v152_v19 = vadd.f32 %v151_v17, %v26_v15 }
  0xcb   :  { %v110_v20 = vpop.f32.mrf.mxu0  ;;  %v153_v21 = vpop.f32.mrf.mxu1 }
  0xcc   :  { %v160_v22 = vmax.f32 %v109_v18, 0.0  ;;  %v162_v23 = vmax.f32 %v152_v19, 0.0  ;;  %v111_v25 = vadd.f32 %v110_v20, %v26_v15  ;;  %v154_v26 = vadd.f32 %v153_v21, %v26_v15 }
  0xcd   :  { %v112_v27 = vpop.f32.mrf.mxu0  ;;  %v155_v28 = vpop.f32.mrf.mxu1 }
  0xce   :  { %168 = vst [vmem:[%s267_s3] sm:$0xff] %v160_v22  ;;  %170 = vst [vmem:[%s267_s3 + $0x10] sm:$0xff] %v162_v23  ;;  %v161_v29 = vmax.f32 %v111_v25, 0.0  ;;  %v163_v30 = vmax.f32 %v154_v26, 0.0  ;;  %v113_v31 = vadd.f32 %v112_v27, %v31_v24  ;;  %v156_v32 = vadd.f32 %v155_v28, %v31_v24 }
  0xcf   :  { %v114_v33 = vpop.f32.mrf.mxu0  ;;  %v157_v34 = vpop.f32.mrf.mxu1 }
  0xd0   :  { %169 = vst [vmem:[%s267_s3 + $0x8] sm:$0xff] %v161_v29  ;;  %171 = vst [vmem:[%s267_s3 + $0x18] sm:$0xff] %v163_v30  ;;  %v164_v35 = vmax.f32 %v113_v31, 0.0  ;;  %v166_v36 = vmax.f32 %v156_v32, 0.0  ;;  %v115_v37 = vadd.f32 %v114_v33, %v31_v24  ;;  %v158_v38 = vadd.f32 %v157_v34, %v31_v24 }
  0xd2   :  { %172 = vst [vmem:[%s267_s3 + $0x20] sm:$0xff] %v164_v35  ;;  %174 = vst [vmem:[%s267_s3 + $0x30] sm:$0xff] %v166_v36  ;;  %v165_v39 = vmax.f32 %v115_v37, 0.0  ;;  %v167_v40 = vmax.f32 %v158_v38, 0.0 }
  0xd4   :  { %173 = vst [vmem:[%s267_s3 + $0x28] sm:$0xff] %v165_v39  ;;  %175 = vst [vmem:[%s267_s3 + $0x38] sm:$0xff] %v167_v40 }

// kernel: cnn_ae_fmnist_forward.10
= control target key start
LH: loop header
LB: loop body
LE: loop exit
PB: predicated region body
PF: predicated region fallthrough
CT: control target
= control target key end

     0   :  { %v252_v0 = vmov 0   ;;  %vm133_vm0 = vcmask 130048   ;;  %s336_s1 = inlined_call_operand.vmem [shape: bf16[144,128], index: 1, kind: input, shape index: {}]   ;;  %s337_s0 = inlined_call_operand.vmem [shape: bf16[32,144], index: 0, kind: input, shape index: {}]   ;;  %s338_s2 = inlined_call_operand.vmem [shape: f32[32,1], index: 2, kind: input, shape index: {}]   ;;  %s339_s3 = inlined_call_operand.vmem [shape: f32[32,128], index: 3, kind: output, shape index: {}]  }
   0x1   :  { %140 = vmatprep.subr.bf16.mxu0 %v252_v0  ;;  %216 = vmatprep.subr.bf16.mxu1 %v252_v0  ;;  %v237_v1 = vld [vmem:[%s336_s1 + $0x38] sm:$0xff]   ;;  %v238_v2 = vld [vmem:[%s336_s1 + $0x30] sm:$0xff]   ;;  %v239_v3 = vld [vmem:[%s336_s1 + $0x28] sm:$0xff]  }
   0x2   :  { %236 = vset.pattern.permute.xlu1 %v252_v0  ;;  %235 = vset.pattern.permute.xlu0 %v252_v0  ;;  %v240_v4 = vld [vmem:[%s336_s1 + $0x20] sm:$0xff]   ;;  %v251_v6 = vld [vmem:[%s337_s0 + $0x14] ss:$8 sps:$4 sm:$0xff]   ;;  %v38_v11 = vld [vmem:[%s338_s2 + $0x8] sm:$0xff] }
   0x3   :  { %141 = vmatpush1.bf16.msra.mxu0 %v237_v1  ;;  %225 = vmatpush1.bf16.msra.mxu1 %v237_v1  ;;  %v248_v5 = vld [vmem:[%s337_s0 + $0x4] ss:$8 sps:$4 sm:$0xff]   ;;  %v39_v7 = vld [vmem:[%s338_s2 + $0x10] sm:$0xff]  ;;  %v40_v9 = vld [vmem:[%s338_s2 + $0x18] sm:$0xff] }
   0x4   :  { %142 = vmatprep.subr.bf16.mxu0 %v252_v0  ;;  %217 = vmatprep.subr.bf16.mxu1 %v252_v0  ;;  %v37_v8 = vld [vmem:[%s338_s2] sm:$0xff]  ;;  %v241_v10 = vld [vmem:[%s336_s1 + $0x18] sm:$0xff]   ;;  %v242_v12 = vld [vmem:[%s336_s1 + $0x10] sm:$0xff]  }
   0x5   :  { %214 = vmatprep.mubr.msk.bf16.mxu0 %vm133_vm0, %v248_v5  ;;  %53 = vperm.xlu1 %236, %v39_v7   ;;  %v243_v13 = vld [vmem:[%s336_s1 + $0x8] sm:$0xff]   ;;  %v244_v14 = vld [vmem:[%s336_s1] sm:$0xff]   ;;  %v249_v17 = vld [vmem:[%s337_s0 + $0x10] ss:$8 sps:$4 sm:$0xff]  }
   0x6   :  { %215 = vmatprep.mubr.msk.bf16.mxu1 %vm133_vm0, %v251_v6  ;;  %43 = vperm.xlu0 %235, %v37_v8   ;;  %v245_v15 = vld [vmem:[%s336_s1 + $0x40] sm:$0xff]  }
   0x7   :  { %143 = vmatpush1.bf16.msra.mxu0 %v238_v2  ;;  %226 = vmatpush1.bf16.msra.mxu1 %v238_v2  ;;  %v246_v16 = vld [vmem:[%s337_s0] ss:$8 sps:$4 sm:$0xff]  }
   0x8   :  { %144 = vmatprep.subr.bf16.mxu0 %v252_v0  ;;  %218 = vmatprep.subr.bf16.mxu1 %v252_v0 }
   0x9   :  { %58 = vperm.xlu1 %236, %v40_v9  }
   0xa   :  { %48 = vperm.xlu0 %235, %v38_v11  }
   0xb   :  { %145 = vmatpush1.bf16.msra.mxu0 %v239_v3  ;;  %227 = vmatpush1.bf16.msra.mxu1 %v239_v3 }
   0xc   :  { %146 = vmatprep.subr.bf16.mxu0 %v252_v0  ;;  %219 = vmatprep.subr.bf16.mxu1 %v252_v0 }
   0xf   :  { %147 = vmatpush1.bf16.msra.mxu0 %v240_v4  ;;  %228 = vmatpush1.bf16.msra.mxu1 %v240_v4 }
  0x10   :  { %148 = vmatprep.subr.bf16.mxu0 %v252_v0  ;;  %220 = vmatprep.subr.bf16.mxu1 %v252_v0 }
  0x13   :  { %149 = vmatpush1.bf16.msra.mxu0 %v241_v10  ;;  %229 = vmatpush1.bf16.msra.mxu1 %v241_v10 }
  0x14   :  { %150 = vmatprep.subr.bf16.mxu0 %v252_v0  ;;  %221 = vmatprep.subr.bf16.mxu1 %v252_v0 }
  0x17   :  { %151 = vmatpush1.bf16.msra.mxu0 %v242_v12  ;;  %230 = vmatpush1.bf16.msra.mxu1 %v242_v12 }
  0x18   :  { %152 = vmatprep.subr.bf16.mxu0 %v252_v0  ;;  %222 = vmatprep.subr.bf16.mxu1 %v252_v0 }
  0x1b   :  { %153 = vmatpush1.bf16.msra.mxu0 %v243_v13  ;;  %231 = vmatpush1.bf16.msra.mxu1 %v243_v13 }
  0x1c   :  { %154 = vmatprep.subr.bf16.mxu0 %v252_v0  ;;  %223 = vmatprep.subr.bf16.mxu1 %v252_v0 }
  0x1f   :  { %155 = vmatpush1.bf16.msra.mxu0 %v244_v14  ;;  %232 = vmatpush1.bf16.msra.mxu1 %v244_v14 }
  0x20   :  { %170 = vmatprep.subr.bf16.mxu0 %v252_v0  ;;  %224 = vmatprep.subr.bf16.mxu1 %v252_v0 }
  0x23   :  { %171 = vmatpush2.bf16.msra.mxu0 %v245_v15  ;;  %233 = vmatpush2.bf16.msra.mxu1 %v245_v15 }
  0x26   :  { %173 = vmatmul.mubr.bf16.vlgmr.msra.gmra.mxu0 %v246_v16  ;;  %181 = vmatmul.mubr.bf16.vlgmr.msra.gmra.mxu1 %v249_v17 }
  0x80   :  { %v54_v18 = vpop.permute.xlu1 %53 }
  0x81   :  { %v44_v19 = vpop.permute.xlu0 %43 }
  0x84   :  { %v59_v26 = vpop.permute.xlu1 %58 }
  0x85   :  { %v49_v27 = vpop.permute.xlu0 %48 }
  0xe6   :  { %v174_v20 = vpop.f32.mrf.mxu0  ;;  %v182_v21 = vpop.f32.mrf.mxu1 }
  0xe7   :  { %v175_v22 = vadd.f32 %v174_v20, %v44_v19  ;;  %v183_v23 = vadd.f32 %v182_v21, %v54_v18 }
  0xe8   :  { %v176_v24 = vpop.f32.mrf.mxu0  ;;  %v184_v25 = vpop.f32.mrf.mxu1 }
  0xe9   :  { %v189_v28 = vmax.f32 %v175_v22, 0.0  ;;  %v191_v29 = vmax.f32 %v183_v23, 0.0 }
  0xea   :  { %v177_v30 = vpop.f32.mrf.mxu0  ;;  %v185_v31 = vpop.f32.mrf.mxu1 }
  0xeb   :  { %193 = vst [vmem:[%s339_s3] sm:$0xff] %v189_v28  ;;  %195 = vst [vmem:[%s339_s3 + $0x10] sm:$0xff] %v191_v29  ;;  %v178_v32 = vadd.f32 %v177_v30, %v49_v27  ;;  %v186_v33 = vadd.f32 %v185_v31, %v59_v26 }
  0xec   :  { %v179_v34 = vpop.f32.mrf.mxu0  ;;  %v187_v35 = vpop.f32.mrf.mxu1 }
  0xed   :  { %v190_v36 = vmax.f32 %v178_v32, 0.0  ;;  %v192_v37 = vmax.f32 %v186_v33, 0.0 }
  0xef   :  { %194 = vst [vmem:[%s339_s3 + $0x8] sm:$0xff] %v190_v36  ;;  %196 = vst [vmem:[%s339_s3 + $0x18] sm:$0xff] %v192_v37 }

// kernel: cnn_ae_fmnist_forward.11
= control target key start
LH: loop header
LB: loop body
LE: loop exit
PB: predicated region body
PF: predicated region fallthrough
CT: control target
= control target key end

     0   :  { %v1934_v1 = vmov 0   ;;  %vm1477_vm0 = vcmask 64512   ;;  %s2399_s1 = inlined_call_operand.vmem [shape: bf16[2048,8], index: 1, kind: input, shape index: {}]   ;;  %s2400_s0 = inlined_call_operand.vmem [shape: bf16[16,2048], index: 0, kind: input, shape index: {}]   ;;  %s2401_s2 = inlined_call_operand.vmem [shape: f32[16,1], index: 2, kind: input, shape index: {}]   ;;  %s2402_s3 = inlined_call_operand.vmem [shape: f32[16,8], index: 3, kind: output, shape index: {}]  }
   0x1   :  { %v1806_v0 = vld [vmem:[%s2399_s1 + $0x78] sm:$0xff]   ;;  %1805 = vset.pattern.permute.xlu0 %v1934_v1  ;;  %v1810_v5 = vld [vmem:[%s2399_s1 + $0x70] sm:$0xff]   ;;  %v1814_v9 = vld [vmem:[%s2399_s1 + $0x68] sm:$0xff]  }
   0x2   :  { %v1807_v2 = vld [vmem:[%s2399_s1 + $0xf8] sm:$0xff]   ;;  %1628 = vmatprep.subr.bf16.mxu0 %v1806_v0  ;;  %v1811_v6 = vld [vmem:[%s2399_s1 + $0xf0] sm:$0xff]   ;;  %v1815_v10 = vld [vmem:[%s2399_s1 + $0xe8] sm:$0xff]  }
   0x3   :  { %v1808_v3 = vld [vmem:[%s2399_s1 + $0x38] sm:$0xff]   ;;  %1650 = vmatprep.subr.bf16.mxu1 %v1807_v2  ;;  %v1812_v7 = vld [vmem:[%s2399_s1 + $0x30] sm:$0xff]   ;;  %v1816_v11 = vld [vmem:[%s2399_s1 + $0x28] sm:$0xff]  }
   0x4   :  { %v1809_v4 = vld [vmem:[%s2399_s1 + $0xb8] sm:$0xff]   ;;  %1629 = vmatpush3.bf16.msra.mxu0 %v1808_v3  ;;  %v1813_v8 = vld [vmem:[%s2399_s1 + $0xb0] sm:$0xff]   ;;  %v1817_v12 = vld [vmem:[%s2399_s1 + $0xa8] sm:$0xff]  }
   0x5   :  { %1651 = vmatpush3.bf16.msra.mxu1 %v1809_v4  ;;  %1630 = vmatprep.subr.bf16.mxu0 %v1810_v5  ;;  %v1818_v13 = vld [vmem:[%s2399_s1 + $0x60] sm:$0xff]   ;;  %v1822_v17 = vld [vmem:[%s2399_s1 + $0x58] sm:$0xff]   ;;  %v1826_v21 = vld [vmem:[%s2399_s1 + $0x50] sm:$0xff]  }
   0x6   :  { %1652 = vmatprep.subr.bf16.mxu1 %v1811_v6  ;;  %v1819_v14 = vld [vmem:[%s2399_s1 + $0xe0] sm:$0xff]   ;;  %v1823_v18 = vld [vmem:[%s2399_s1 + $0xd8] sm:$0xff]   ;;  %v1827_v22 = vld [vmem:[%s2399_s1 + $0xd0] sm:$0xff]  }
   0x7   :  { %v1820_v15 = vld [vmem:[%s2399_s1 + $0x20] sm:$0xff]   ;;  %v1824_v19 = vld [vmem:[%s2399_s1 + $0x18] sm:$0xff]   ;;  %v1828_v23 = vld [vmem:[%s2399_s1 + $0x10] sm:$0xff]  }
   0x8   :  { %1631 = vmatpush3.bf16.msra.mxu0 %v1812_v7  ;;  %v1821_v16 = vld [vmem:[%s2399_s1 + $0xa0] sm:$0xff]   ;;  %v1825_v20 = vld [vmem:[%s2399_s1 + $0x98] sm:$0xff]   ;;  %v1829_v24 = vld [vmem:[%s2399_s1 + $0x90] sm:$0xff]  }
   0x9   :  { %1653 = vmatpush3.bf16.msra.mxu1 %v1813_v8  ;;  %1632 = vmatprep.subr.bf16.mxu0 %v1814_v9  ;;  %v1830_v25 = vld [vmem:[%s2399_s1 + $0x48] sm:$0xff]   ;;  %v1834_v29 = vld [vmem:[%s2399_s1 + $0x40] sm:$0xff]   ;;  %v1838_v41 = vld [vmem:[%s2399_s1 + $0x178] sm:$0xff]  }
   0xa   :  { %1654 = vmatprep.subr.bf16.mxu1 %v1815_v10  ;;  %v1831_v26 = vld [vmem:[%s2399_s1 + $0xc8] sm:$0xff]   ;;  %v1835_v30 = vld [vmem:[%s2399_s1 + $0xc0] sm:$0xff]   ;;  %v1839_v42 = vld [vmem:[%s2399_s1 + $0x1f8] sm:$0xff]  }
   0xb   :  { %v1832_v27 = vld [vmem:[%s2399_s1 + $0x8] sm:$0xff]   ;;  %v1836_v31 = vld [vmem:[%s2399_s1] sm:$0xff]   ;;  %v1840_v43 = vld [vmem:[%s2399_s1 + $0x138] sm:$0xff]  }
   0xc   :  { %1633 = vmatpush3.bf16.msra.mxu0 %v1816_v11  ;;  %v1833_v28 = vld [vmem:[%s2399_s1 + $0x88] sm:$0xff]   ;;  %v1837_v32 = vld [vmem:[%s2399_s1 + $0x80] sm:$0xff]   ;;  %v1841_v44 = vld [vmem:[%s2399_s1 + $0x1b8] sm:$0xff]  }
   0xd   :  { %1655 = vmatpush3.bf16.msra.mxu1 %v1817_v12  ;;  %1634 = vmatprep.subr.bf16.mxu0 %v1818_v13  ;;  %v15_v33 = vld [vmem:[%s2400_s0] sm:$0xff]  ;;  %v16_v35 = vld [vmem:[%s2400_s0 + $0x8] sm:$0xff]  ;;  %v1842_v45 = vld [vmem:[%s2399_s1 + $0x170] sm:$0xff]  }
   0xe   :  { %1656 = vmatprep.subr.bf16.mxu1 %v1819_v14  ;;  %v23_v34 = vld [vmem:[%s2400_s0 + $0x40] sm:$0xff]  ;;  %v24_v38 = vld [vmem:[%s2400_s0 + $0x48] sm:$0xff]  ;;  %v1843_v46 = vld [vmem:[%s2399_s1 + $0x1f0] sm:$0xff]  }
   0xf   :  { %v1484_v36 = vcombine.low %v15_v33, %v23_v34  ;;  %v1485_v37 = vcombine.high %v15_v33, %v23_v34  ;;  %v1486_v39 = vcombine.low %v16_v35, %v24_v38  ;;  %v1487_v40 = vcombine.high %v16_v35, %v24_v38  ;;  %v1844_v47 = vld [vmem:[%s2399_s1 + $0x130] sm:$0xff]   ;;  %v1846_v49 = vld [vmem:[%s2399_s1 + $0x168] sm:$0xff]   ;;  %v1850_v53 = vld [vmem:[%s2399_s1 + $0x160] sm:$0xff]  }
  0x10   :  { %1635 = vmatpush3.bf16.msra.mxu0 %v1820_v15  ;;  %v1845_v48 = vld [vmem:[%s2399_s1 + $0x1b0] sm:$0xff]   ;;  %v1847_v50 = vld [vmem:[%s2399_s1 + $0x1e8] sm:$0xff]   ;;  %v1851_v54 = vld [vmem:[%s2399_s1 + $0x1e0] sm:$0xff]  }
  0x11   :  { %1657 = vmatpush3.bf16.msra.mxu1 %v1821_v16  ;;  %1636 = vmatprep.subr.bf16.mxu0 %v1822_v17  ;;  %v1848_v51 = vld [vmem:[%s2399_s1 + $0x128] sm:$0xff]   ;;  %v1852_v55 = vld [vmem:[%s2399_s1 + $0x120] sm:$0xff]   ;;  %v1854_v57 = vld [vmem:[%s2399_s1 + $0x158] sm:$0xff]  }
  0x12   :  { %1658 = vmatprep.subr.bf16.mxu1 %v1823_v18  ;;  %1179 = vmatprep.mubr.bf16.mxu0 %v1485_v37  ;;  %v1849_v52 = vld [vmem:[%s2399_s1 + $0x1a8] sm:$0xff]   ;;  %v1853_v56 = vld [vmem:[%s2399_s1 + $0x1a0] sm:$0xff]   ;;  %v1855_v58 = vld [vmem:[%s2399_s1 + $0x1d8] sm:$0xff]  }
  0x13   :  { %1220 = vmatprep.mubr.bf16.mxu1 %v1487_v40  ;;  %v1856_v59 = vld [vmem:[%s2399_s1 + $0x118] sm:$0xff]   ;;  %v1858_v61 = vld [vmem:[%s2399_s1 + $0x150] sm:$0xff]   ;;  %v1862_v1 = vld [vmem:[%s2399_s1 + $0x148] sm:$0xff]  }
  0x14   :  { %1637 = vmatpush3.bf16.msra.mxu0 %v1824_v19  ;;  %v1857_v60 = vld [vmem:[%s2399_s1 + $0x198] sm:$0xff]   ;;  %v1859_v62 = vld [vmem:[%s2399_s1 + $0x1d0] sm:$0xff]   ;;  %v1863_v2 = vld [vmem:[%s2399_s1 + $0x1c8] sm:$0xff]  }
  0x15   :  { %1659 = vmatpush3.bf16.msra.mxu1 %v1825_v20  ;;  %1638 = vmatprep.subr.bf16.mxu0 %v1826_v21  ;;  %v1860_v63 = vld [vmem:[%s2399_s1 + $0x110] sm:$0xff]   ;;  %v1864_v3 = vld [vmem:[%s2399_s1 + $0x108] sm:$0xff]   ;;  %v1866_v5 = vld [vmem:[%s2399_s1 + $0x140] sm:$0xff]  }
  0x16   :  { %1660 = vmatprep.subr.bf16.mxu1 %v1827_v22  ;;  %v1861_v0 = vld [vmem:[%s2399_s1 + $0x190] sm:$0xff]   ;;  %v1865_v4 = vld [vmem:[%s2399_s1 + $0x188] sm:$0xff]   ;;  %v1867_v6 = vld [vmem:[%s2399_s1 + $0x1c0] sm:$0xff]  }
  0x17   :  { %v1868_v7 = vld [vmem:[%s2399_s1 + $0x100] sm:$0xff]   ;;  %v17_v9 = vld [vmem:[%s2400_s0 + $0x10] sm:$0xff]  ;;  %v18_v13 = vld [vmem:[%s2400_s0 + $0x18] sm:$0xff] }
  0x18   :  { %1639 = vmatpush3.bf16.msra.mxu0 %v1828_v23  ;;  %v1869_v8 = vld [vmem:[%s2399_s1 + $0x180] sm:$0xff]   ;;  %v25_v10 = vld [vmem:[%s2400_s0 + $0x50] sm:$0xff]  ;;  %v26_v14 = vld [vmem:[%s2400_s0 + $0x58] sm:$0xff] }
  0x19   :  { %1661 = vmatpush3.bf16.msra.mxu1 %v1829_v24  ;;  %1640 = vmatprep.subr.bf16.mxu0 %v1830_v25  ;;  %v1488_v11 = vcombine.low %v17_v9, %v25_v10  ;;  %v1489_v12 = vcombine.high %v17_v9, %v25_v10  ;;  %v1490_v15 = vcombine.low %v18_v13, %v26_v14  ;;  %v1870_v17 = vld [vmem:[%s2399_s1 + $0x278] sm:$0xff]   ;;  %v1874_v21 = vld [vmem:[%s2399_s1 + $0x270] sm:$0xff]   ;;  %v1878_v25 = vld [vmem:[%s2399_s1 + $0x268] sm:$0xff]  }
  0x1a   :  { %1662 = vmatprep.subr.bf16.mxu1 %v1831_v26  ;;  %v1491_v16 = vcombine.high %v18_v13, %v26_v14  ;;  %v1871_v18 = vld [vmem:[%s2399_s1 + $0x2f8] sm:$0xff]   ;;  %v1875_v22 = vld [vmem:[%s2399_s1 + $0x2f0] sm:$0xff]   ;;  %v1879_v26 = vld [vmem:[%s2399_s1 + $0x2e8] sm:$0xff]  }
  0x1b   :  { %v1872_v19 = vld [vmem:[%s2399_s1 + $0x238] sm:$0xff]   ;;  %v1876_v23 = vld [vmem:[%s2399_s1 + $0x230] sm:$0xff]   ;;  %v1916_v9 = vld [vmem:[%s2399_s1 + $0x320] sm:$0xff]  }
  0x1c   :  { %1641 = vmatpush3.bf16.msra.mxu0 %v1832_v27  ;;  %v1873_v20 = vld [vmem:[%s2399_s1 + $0x2b8] sm:$0xff]   ;;  %v1877_v24 = vld [vmem:[%s2399_s1 + $0x2b0] sm:$0xff]   ;;  %v1880_v27 = vld [vmem:[%s2399_s1 + $0x228] sm:$0xff]  }
  0x1d   :  { %1663 = vmatpush3.bf16.msra.mxu1 %v1833_v28  ;;  %1642 = vmatprep.subr.bf16.mxu0 %v1834_v29  ;;  %v1881_v28 = vld [vmem:[%s2399_s1 + $0x2a8] sm:$0xff]   ;;  %v1882_v29 = vld [vmem:[%s2399_s1 + $0x260] sm:$0xff]   ;;  %v1886_v33 = vld [vmem:[%s2399_s1 + $0x258] sm:$0xff]  }
  0x1e   :  { %1664 = vmatprep.subr.bf16.mxu1 %v1835_v30  ;;  %v1883_v30 = vld [vmem:[%s2399_s1 + $0x2e0] sm:$0xff]   ;;  %v1887_v34 = vld [vmem:[%s2399_s1 + $0x2d8] sm:$0xff]   ;;  %v1890_v37 = vld [vmem:[%s2399_s1 + $0x250] sm:$0xff]  }
  0x1f   :  { %v1888_v35 = vld [vmem:[%s2399_s1 + $0x218] sm:$0xff]   ;;  %v1891_v38 = vld [vmem:[%s2399_s1 + $0x2d0] sm:$0xff]   ;;  %v1917_v10 = vld [vmem:[%s2399_s1 + $0x3a0] sm:$0xff]  }
  0x20   :  { %1643 = vmatpush3.bf16.msra.mxu0 %v1836_v31  ;;  %v1884_v31 = vld [vmem:[%s2399_s1 + $0x220] sm:$0xff]   ;;  %v1893_v40 = vld [vmem:[%s2399_s1 + $0x290] sm:$0xff]   ;;  %v1920_v13 = vld [vmem:[%s2399_s1 + $0x318] sm:$0xff]  }
  0x21   :  { %1665 = vmatpush3.bf16.msra.mxu1 %v1837_v32  ;;  %1672 = vmatprep.subr.bf16.mxu0 %v1838_v41  ;;  %v1885_v32 = vld [vmem:[%s2399_s1 + $0x2a0] sm:$0xff]   ;;  %v1894_v41 = vld [vmem:[%s2399_s1 + $0x248] sm:$0xff]   ;;  %v1921_v14 = vld [vmem:[%s2399_s1 + $0x398] sm:$0xff]  }
  0x22   :  { %1694 = vmatprep.subr.bf16.mxu1 %v1839_v42  ;;  %v1895_v42 = vld [vmem:[%s2399_s1 + $0x2c8] sm:$0xff]  }
  0x23   :  { %1180 = vmatmul.mubr.bf16.vlgmr.msra.gmra.mxu0 %v1484_v36  ;;  %v1889_v36 = vld [vmem:[%s2399_s1 + $0x298] sm:$0xff]  }
  0x24   :  { %1221 = vmatmul.mubr.bf16.vlgmr.msra.gmra.mxu1 %v1486_v39  ;;  %1673 = vmatpush3.bf16.msra.mxu0 %v1840_v43  ;;  %v1892_v39 = vld [vmem:[%s2399_s1 + $0x210] sm:$0xff]   ;;  %v1896_v43 = vld [vmem:[%s2399_s1 + $0x208] sm:$0xff]  }
  0x25   :  { %1695 = vmatpush3.bf16.msra.mxu1 %v1841_v44  ;;  %1674 = vmatprep.subr.bf16.mxu0 %v1842_v45  ;;  %v1897_v44 = vld [vmem:[%s2399_s1 + $0x288] sm:$0xff]   ;;  %v1898_v45 = vld [vmem:[%s2399_s1 + $0x240] sm:$0xff]  }
  0x26   :  { %1696 = vmatprep.subr.bf16.mxu1 %v1843_v46  ;;  %1261 = vmatprep.mubr.bf16.mxu0 %v1489_v12  ;;  %v1899_v46 = vld [vmem:[%s2399_s1 + $0x2c0] sm:$0xff]   ;;  %v1919_v12 = vld [vmem:[%s2399_s1 + $0x3d8] sm:$0xff]  }
  0x27   :  { %1302 = vmatprep.mubr.bf16.mxu1 %v1491_v16  ;;  %v1923_v16 = vld [vmem:[%s2399_s1 + $0x3d0] sm:$0xff]  }
  0x28   :  { %1675 = vmatpush3.bf16.msra.mxu0 %v1844_v47  ;;  %v1900_v47 = vld [vmem:[%s2399_s1 + $0x200] sm:$0xff]  }
  0x29   :  { %1697 = vmatpush3.bf16.msra.mxu1 %v1845_v48  ;;  %1676 = vmatprep.subr.bf16.mxu0 %v1846_v49  ;;  %v1901_v48 = vld [vmem:[%s2399_s1 + $0x280] sm:$0xff]  }
  0x2a   :  { %1698 = vmatprep.subr.bf16.mxu1 %v1847_v50  ;;  %v19_v49 = vld [vmem:[%s2400_s0 + $0x20] sm:$0xff] }
  0x2b   :  { %v27_v50 = vld [vmem:[%s2400_s0 + $0x60] sm:$0xff] }
  0x2c   :  { %1677 = vmatpush3.bf16.msra.mxu0 %v1848_v51  ;;  %v20_v51 = vld [vmem:[%s2400_s0 + $0x28] sm:$0xff] }
  0x2d   :  { %1699 = vmatpush3.bf16.msra.mxu1 %v1849_v52  ;;  %1678 = vmatprep.subr.bf16.mxu0 %v1850_v53  ;;  %v28_v52 = vld [vmem:[%s2400_s0 + $0x68] sm:$0xff]  ;;  %v1492_v53 = vcombine.low %v19_v49, %v27_v50 }
  0x2e   :  { %1700 = vmatprep.subr.bf16.mxu1 %v1851_v54  ;;  %v1493_v54 = vcombine.high %v19_v49, %v27_v50 }
  0x30   :  { %1679 = vmatpush3.bf16.msra.mxu0 %v1852_v55  ;;  %v1494_v55 = vcombine.low %v20_v51, %v28_v52 }
  0x31   :  { %1701 = vmatpush3.bf16.msra.mxu1 %v1853_v56  ;;  %1680 = vmatprep.subr.bf16.mxu0 %v1854_v57  ;;  %v1495_v56 = vcombine.high %v20_v51, %v28_v52  ;;  %v1902_v57 = vld [vmem:[%s2399_s1 + $0x378] sm:$0xff]  }
  0x32   :  { %1702 = vmatprep.subr.bf16.mxu1 %v1855_v58  ;;  %v1903_v58 = vld [vmem:[%s2399_s1 + $0x3f8] sm:$0xff]  }
  0x34   :  { %1681 = vmatpush3.bf16.msra.mxu0 %v1856_v59  ;;  %v1904_v59 = vld [vmem:[%s2399_s1 + $0x338] sm:$0xff]  }
  0x35   :  { %1703 = vmatpush3.bf16.msra.mxu1 %v1857_v60  ;;  %1682 = vmatprep.subr.bf16.mxu0 %v1858_v61  ;;  %v1905_v60 = vld [vmem:[%s2399_s1 + $0x3b8] sm:$0xff]   ;;  %v1906_v61 = vld [vmem:[%s2399_s1 + $0x370] sm:$0xff]  }
  0x36   :  { %1704 = vmatprep.subr.bf16.mxu1 %v1859_v62  ;;  %v1907_v62 = vld [vmem:[%s2399_s1 + $0x3f0] sm:$0xff]  }
  0x38   :  { %1683 = vmatpush3.bf16.msra.mxu0 %v1860_v63  ;;  %v1908_v63 = vld [vmem:[%s2399_s1 + $0x330] sm:$0xff]  }
  0x39   :  { %1705 = vmatpush3.bf16.msra.mxu1 %v1861_v0  ;;  %1684 = vmatprep.subr.bf16.mxu0 %v1862_v1  ;;  %v1909_v0 = vld [vmem:[%s2399_s1 + $0x3b0] sm:$0xff]   ;;  %v1910_v1 = vld [vmem:[%s2399_s1 + $0x368] sm:$0xff]  }
  0x3a   :  { %1706 = vmatprep.subr.bf16.mxu1 %v1863_v2  ;;  %v1911_v2 = vld [vmem:[%s2399_s1 + $0x3e8] sm:$0xff]  }
  0x3c   :  { %1685 = vmatpush3.bf16.msra.mxu0 %v1864_v3  ;;  %v287_v3 = vld [vmem:[%s2401_s2] sm:$0xff] }
  0x3d   :  { %1707 = vmatpush3.bf16.msra.mxu1 %v1865_v4  ;;  %1686 = vmatprep.subr.bf16.mxu0 %v1866_v5  ;;  %v1912_v4 = vld [vmem:[%s2399_s1 + $0x328] sm:$0xff]  }
  0x3e   :  { %1708 = vmatprep.subr.bf16.mxu1 %v1867_v6  ;;  %291 = vperm.xlu0 %1805, %v287_v3   ;;  %v1913_v5 = vld [vmem:[%s2399_s1 + $0x3a8] sm:$0xff]   ;;  %v1914_v6 = vld [vmem:[%s2399_s1 + $0x360] sm:$0xff]  }
  0x40   :  { %1687 = vmatpush3.bf16.msra.mxu0 %v1868_v7  ;;  %v1915_v7 = vld [vmem:[%s2399_s1 + $0x3e0] sm:$0xff]  }
  0x41   :  { %1709 = vmatpush3.bf16.msra.mxu1 %v1869_v8  ;;  %1716 = vmatprep.subr.bf16.mxu0 %v1870_v17  ;;  %v288_v8 = vld [vmem:[%s2401_s2 + $0x8] sm:$0xff]  ;;  %v1924_v17 = vld [vmem:[%s2399_s1 + $0x310] sm:$0xff]  }
  0x42   :  { %1738 = vmatprep.subr.bf16.mxu1 %v1871_v18  ;;  %296 = vperm.xlu0 %1805, %v288_v8   ;;  %v1925_v18 = vld [vmem:[%s2399_s1 + $0x390] sm:$0xff]  }
  0x43   :  { %1262 = vmatmul.mubr.bf16.vlgmr.msra.gmra.mxu0 %v1488_v11  ;;  %v1918_v11 = vld [vmem:[%s2399_s1 + $0x358] sm:$0xff]  }
  0x44   :  { %1303 = vmatmul.mubr.bf16.vlgmr.msra.gmra.mxu1 %v1490_v15  ;;  %1717 = vmatpush3.bf16.msra.mxu0 %v1872_v19  ;;  %v1922_v15 = vld [vmem:[%s2399_s1 + $0x350] sm:$0xff]   ;;  %v1926_v19 = vld [vmem:[%s2399_s1 + $0x348] sm:$0xff]  }
  0x45   :  { %1739 = vmatpush3.bf16.msra.mxu1 %v1873_v20  ;;  %1718 = vmatprep.subr.bf16.mxu0 %v1874_v21  ;;  %v1927_v20 = vld [vmem:[%s2399_s1 + $0x3c8] sm:$0xff]  }
  0x46   :  { %1740 = vmatprep.subr.bf16.mxu1 %v1875_v22  ;;  %1343 = vmatprep.mubr.bf16.mxu0 %v1493_v54  ;;  %v1928_v21 = vld [vmem:[%s2399_s1 + $0x308] sm:$0xff]  }
  0x47   :  { %1384 = vmatprep.mubr.bf16.mxu1 %v1495_v56  ;;  %v1929_v22 = vld [vmem:[%s2399_s1 + $0x388] sm:$0xff]  }
  0x48   :  { %1719 = vmatpush3.bf16.msra.mxu0 %v1876_v23  ;;  %v1930_v23 = vld [vmem:[%s2399_s1 + $0x340] sm:$0xff]  }
  0x49   :  { %1741 = vmatpush3.bf16.msra.mxu1 %v1877_v24  ;;  %1720 = vmatprep.subr.bf16.mxu0 %v1878_v25  ;;  %v1931_v24 = vld [vmem:[%s2399_s1 + $0x3c0] sm:$0xff]  }
  0x4a   :  { %1742 = vmatprep.subr.bf16.mxu1 %v1879_v26  ;;  %v1932_v25 = vld [vmem:[%s2399_s1 + $0x300] sm:$0xff]  }
  0x4b   :  { %v1933_v26 = vld [vmem:[%s2399_s1 + $0x380] sm:$0xff]  }
  0x4c   :  { %1721 = vmatpush3.bf16.msra.mxu0 %v1880_v27  ;;  %v21_v27 = vld [vmem:[%s2400_s0 + $0x30] sm:$0xff] }
  0x4d   :  { %1743 = vmatpush3.bf16.msra.mxu1 %v1881_v28  ;;  %1722 = vmatprep.subr.bf16.mxu0 %v1882_v29  ;;  %v29_v28 = vld [vmem:[%s2400_s0 + $0x70] sm:$0xff]  ;;  %v22_v29 = vld [vmem:[%s2400_s0 + $0x38] sm:$0xff] }
  0x4e   :  { %1744 = vmatprep.subr.bf16.mxu1 %v1883_v30  ;;  %v30_v30 = vld [vmem:[%s2400_s0 + $0x78] sm:$0xff] }
  0x50   :  { %1723 = vmatpush3.bf16.msra.mxu0 %v1884_v31  ;;  %v1496_v31 = vcombine.low %v21_v27, %v29_v28 }
  0x51   :  { %1745 = vmatpush3.bf16.msra.mxu1 %v1885_v32  ;;  %1724 = vmatprep.subr.bf16.mxu0 %v1886_v33  ;;  %v1497_v32 = vcombine.high %v21_v27, %v29_v28  ;;  %v1498_v33 = vcombine.low %v22_v29, %v30_v30 }
  0x52   :  { %1746 = vmatprep.subr.bf16.mxu1 %v1887_v34  ;;  %v1499_v34 = vcombine.high %v22_v29, %v30_v30 }
  0x54   :  { %1725 = vmatpush3.bf16.msra.mxu0 %v1888_v35 }
  0x55   :  { %1747 = vmatpush3.bf16.msra.mxu1 %v1889_v36  ;;  %1726 = vmatprep.subr.bf16.mxu0 %v1890_v37 }
  0x56   :  { %1748 = vmatprep.subr.bf16.mxu1 %v1891_v38 }
  0x58   :  { %1727 = vmatpush3.bf16.msra.mxu0 %v1892_v39 }
  0x59   :  { %1749 = vmatpush3.bf16.msra.mxu1 %v1893_v40  ;;  %1728 = vmatprep.subr.bf16.mxu0 %v1894_v41 }
  0x5a   :  { %1750 = vmatprep.subr.bf16.mxu1 %v1895_v42 }
  0x5c   :  { %1729 = vmatpush3.bf16.msra.mxu0 %v1896_v43 }
  0x5d   :  { %1751 = vmatpush3.bf16.msra.mxu1 %v1897_v44  ;;  %1730 = vmatprep.subr.bf16.mxu0 %v1898_v45 }
  0x5e   :  { %1752 = vmatprep.subr.bf16.mxu1 %v1899_v46 }
  0x60   :  { %1731 = vmatpush3.bf16.msra.mxu0 %v1900_v47 }
  0x61   :  { %1753 = vmatpush3.bf16.msra.mxu1 %v1901_v48  ;;  %1760 = vmatprep.subr.bf16.mxu0 %v1902_v57 }
  0x62   :  { %1782 = vmatprep.subr.bf16.mxu1 %v1903_v58 }
  0x63   :  { %1344 = vmatmul.mubr.bf16.vlgmr.msra.gmra.mxu0 %v1492_v53 }
  0x64   :  { %1385 = vmatmul.mubr.bf16.vlgmr.msra.gmra.mxu1 %v1494_v55  ;;  %1761 = vmatpush3.bf16.msra.mxu0 %v1904_v59 }
  0x65   :  { %1783 = vmatpush3.bf16.msra.mxu1 %v1905_v60  ;;  %1762 = vmatprep.subr.bf16.mxu0 %v1906_v61 }
  0x66   :  { %1784 = vmatprep.subr.bf16.mxu1 %v1907_v62  ;;  %1425 = vmatprep.mubr.bf16.mxu0 %v1497_v32 }
  0x67   :  { %1466 = vmatprep.mubr.bf16.mxu1 %v1499_v34 }
  0x68   :  { %1763 = vmatpush3.bf16.msra.mxu0 %v1908_v63 }
  0x69   :  { %1785 = vmatpush3.bf16.msra.mxu1 %v1909_v0  ;;  %1764 = vmatprep.subr.bf16.mxu0 %v1910_v1 }
  0x6a   :  { %1786 = vmatprep.subr.bf16.mxu1 %v1911_v2 }
  0x6c   :  { %1765 = vmatpush3.bf16.msra.mxu0 %v1912_v4 }
  0x6d   :  { %1787 = vmatpush3.bf16.msra.mxu1 %v1913_v5  ;;  %1766 = vmatprep.subr.bf16.mxu0 %v1914_v6 }
  0x6e   :  { %1788 = vmatprep.subr.bf16.mxu1 %v1915_v7 }
  0x70   :  { %1767 = vmatpush3.bf16.msra.mxu0 %v1916_v9 }
  0x71   :  { %1789 = vmatpush3.bf16.msra.mxu1 %v1917_v10  ;;  %1768 = vmatprep.subr.bf16.mxu0 %v1918_v11 }
  0x72   :  { %1790 = vmatprep.subr.bf16.mxu1 %v1919_v12 }
  0x74   :  { %1769 = vmatpush3.bf16.msra.mxu0 %v1920_v13 }
  0x75   :  { %1791 = vmatpush3.bf16.msra.mxu1 %v1921_v14  ;;  %1770 = vmatprep.subr.bf16.mxu0 %v1922_v15 }
  0x76   :  { %1792 = vmatprep.subr.bf16.mxu1 %v1923_v16 }
  0x78   :  { %1771 = vmatpush3.bf16.msra.mxu0 %v1924_v17 }
  0x79   :  { %1793 = vmatpush3.bf16.msra.mxu1 %v1925_v18  ;;  %1772 = vmatprep.subr.bf16.mxu0 %v1926_v19 }
  0x7a   :  { %1794 = vmatprep.subr.bf16.mxu1 %v1927_v20 }
  0x7c   :  { %1773 = vmatpush3.bf16.msra.mxu0 %v1928_v21 }
  0x7d   :  { %1795 = vmatpush3.bf16.msra.mxu1 %v1929_v22  ;;  %1774 = vmatprep.subr.bf16.mxu0 %v1930_v23 }
  0x7e   :  { %1796 = vmatprep.subr.bf16.mxu1 %v1931_v24 }
  0x80   :  { %1775 = vmatpush3.bf16.msra.mxu0 %v1932_v25 }
  0x81   :  { %1797 = vmatpush3.bf16.msra.mxu1 %v1933_v26 }
  0x83   :  { %1426 = vmatmul.mubr.bf16.vlgmr.msra.gmra.mxu0 %v1496_v31 }
  0x84   :  { %1467 = vmatmul.mubr.bf16.vlgmr.msra.gmra.mxu1 %v1498_v33 }
  0xb9   :  { %v292_v49 = vpop.permute.xlu0 %291 }
  0xbd   :  { %v297_v58 = vpop.permute.xlu0 %296 }
  0xe3   :  { %v1644_v35 = vpop.f32.mrf.mxu0 }
  0xe4   :  { %v1666_v36 = vpop.f32.mrf.mxu1 }
  0xe5   :  { %v1645_v37 = vpop.f32.mrf.mxu0 }
  0xe6   :  { %v1667_v38 = vpop.f32.mrf.mxu1  ;;  %v1646_v51 = vadd.f32 %v1645_v37, %v1644_v35 }
  0xe7   :  { %v1647_v39 = vpop.f32.mrf.mxu0  ;;  %v1668_v55 = vadd.f32 %v1667_v38, %v1666_v36 }
  0xe8   :  { %v1669_v40 = vpop.f32.mrf.mxu1  ;;  %v1182_v56 = vadd.f32 %v1646_v51, %v292_v49 }
  0xe9   :  { %v1648_v41 = vpop.f32.mrf.mxu0 }
  0xea   :  { %v1670_v42 = vpop.f32.mrf.mxu1  ;;  %v1649_v57 = vadd.f32 %v1648_v41, %v1647_v39  ;;  %v1223_v62 = vadd.f32 %v1668_v55, %v1182_v56 }
  0xeb   :  { %v1671_v1 = vadd.f32 %v1670_v42, %v1669_v40 }
  0xec   :  { %v1185_v63 = vadd.f32 %v1649_v57, %v297_v58 }
  0xee   :  { %v1226_v6 = vadd.f32 %v1671_v1, %v1185_v63 }
 0x103   :  { %v1688_v43 = vpop.f32.mrf.mxu0 }
 0x104   :  { %v1710_v44 = vpop.f32.mrf.mxu1 }
 0x105   :  { %v1689_v45 = vpop.f32.mrf.mxu0 }
 0x106   :  { %v1711_v46 = vpop.f32.mrf.mxu1  ;;  %v1690_v60 = vadd.f32 %v1689_v45, %v1688_v43 }
 0x107   :  { %v1691_v47 = vpop.f32.mrf.mxu0  ;;  %v1712_v3 = vadd.f32 %v1711_v46, %v1710_v44 }
 0x108   :  { %v1713_v48 = vpop.f32.mrf.mxu1  ;;  %v1264_v2 = vadd.f32 %v1690_v60, %v1223_v62 }
 0x109   :  { %v1692_v50 = vpop.f32.mrf.mxu0 }
 0x10a   :  { %v1714_v52 = vpop.f32.mrf.mxu1  ;;  %v1693_v4 = vadd.f32 %v1692_v50, %v1691_v47  ;;  %v1305_v9 = vadd.f32 %v1712_v3, %v1264_v2 }
 0x10b   :  { %v1715_v12 = vadd.f32 %v1714_v52, %v1713_v48 }
 0x10c   :  { %v1267_v10 = vadd.f32 %v1693_v4, %v1226_v6 }
 0x10e   :  { %v1308_v18 = vadd.f32 %v1715_v12, %v1267_v10 }
 0x123   :  { %v1732_v53 = vpop.f32.mrf.mxu0 }
 0x124   :  { %v1754_v54 = vpop.f32.mrf.mxu1 }
 0x125   :  { %v1733_v59 = vpop.f32.mrf.mxu0 }
 0x126   :  { %v1755_v61 = vpop.f32.mrf.mxu1  ;;  %v1734_v7 = vadd.f32 %v1733_v59, %v1732_v53 }
 0x127   :  { %v1735_v0 = vpop.f32.mrf.mxu0  ;;  %v1756_v14 = vadd.f32 %v1755_v61, %v1754_v54 }
 0x128   :  { %v1757_v5 = vpop.f32.mrf.mxu1  ;;  %v1346_v13 = vadd.f32 %v1734_v7, %v1305_v9 }
 0x129   :  { %v1736_v8 = vpop.f32.mrf.mxu0 }
 0x12a   :  { %v1758_v11 = vpop.f32.mrf.mxu1  ;;  %v1737_v15 = vadd.f32 %v1736_v8, %v1735_v0  ;;  %v1387_v21 = vadd.f32 %v1756_v14, %v1346_v13 }
 0x12b   :  { %v1759_v26 = vadd.f32 %v1758_v11, %v1757_v5 }
 0x12c   :  { %v1349_v22 = vadd.f32 %v1737_v15, %v1308_v18 }
 0x12e   :  { %v1390_v31 = vadd.f32 %v1759_v26, %v1349_v22 }
 0x143   :  { %v1776_v16 = vpop.f32.mrf.mxu0 }
 0x144   :  { %v1798_v17 = vpop.f32.mrf.mxu1 }
 0x145   :  { %v1777_v19 = vpop.f32.mrf.mxu0 }
 0x146   :  { %v1799_v20 = vpop.f32.mrf.mxu1  ;;  %v1778_v23 = vadd.f32 %v1777_v19, %v1776_v16 }
 0x147   :  { %v1779_v24 = vpop.f32.mrf.mxu0  ;;  %v1800_v28 = vadd.f32 %v1799_v20, %v1798_v17 }
 0x148   :  { %v1801_v25 = vpop.f32.mrf.mxu1  ;;  %v1428_v27 = vadd.f32 %v1778_v23, %v1387_v21 }
 0x149   :  { %v1780_v29 = vpop.f32.mrf.mxu0 }
 0x14a   :  { %v1802_v30 = vpop.f32.mrf.mxu1  ;;  %v1469_v32 = vadd.f32 %v1800_v28, %v1428_v27  ;;  %v1781_v33 = vadd.f32 %v1780_v29, %v1779_v24 }
 0x14b   :  { %v1803_v36 = vadd.f32 %v1802_v30, %v1801_v25 }
 0x14c   :  { %v1475_v34 = vmax.f32 %v1469_v32, 0.0  ;;  %v1431_v35 = vadd.f32 %v1781_v33, %v1390_v31 }
 0x14e   :  { %1478 = vst.msk [vmem:[%s2402_s3] sm:$0xff] %vm1477_vm0, %v1475_v34  ;;  %v1472_v37 = vadd.f32 %v1803_v36, %v1431_v35 }
 0x150   :  { %v1476_v38 = vmax.f32 %v1472_v37, 0.0 }
 0x152   :  { %1479 = vst.msk [vmem:[%s2402_s3 + $0x8] sm:$0xff] %vm1477_vm0, %v1476_v38 }

// kernel: cnn_ae_fmnist_forward.12
= control target key start
LH: loop header
LB: loop body
LE: loop exit
PB: predicated region body
PF: predicated region fallthrough
CT: control target
= control target key end

     0   :  { %v134_v0 = vmov 0.0   ;;  %vm135_vm0 = vmmov 0   ;;  %v136_v2 = vmov 0   ;;  %vm54_vm1 = vcmask 523264   ;;  %s178_s1 = inlined_call_operand.vmem [shape: bf16[64,8], index: 1, kind: input, shape index: {}]   ;;  %s179_s2 = inlined_call_operand.vmem [shape: f32[8,1], index: 2, kind: input, shape index: {}]   ;;  %s180_s0 = inlined_call_operand.vmem [shape: bf16[8,64], index: 0, kind: input, shape index: {}]   ;;  %s181_s3 = inlined_call_operand.vmem [shape: f32[8,8], index: 3, kind: output, shape index: {}]  }
   0x1   :  { %114 = vmatprep.subr.bf16.mxu0 %v134_v0  ;;  %v130_v1 = vld [vmem:[%s178_s1 + $0x18] sm:$0xff]   ;;  %122 = vmatprep.mubr.msk.bf16.mxu0 %vm135_vm0, %v134_v0  ;;  %v131_v3 = vld [vmem:[%s178_s1 + $0x10] sm:$0xff]   ;;  %v24_v4 = vld [vmem:[%s179_s2] sm:$0xff]  ;;  %vm98_vm2 = vcmask 64512  }
   0x2   :  { %129 = vset.pattern.permute.xlu0 %v136_v2  ;;  %115 = vmatpush3.bf16.msra.mxu0 %v130_v1  ;;  %v132_v5 = vld [vmem:[%s178_s1 + $0x8] sm:$0xff]   ;;  %v133_v6 = vld [vmem:[%s178_s1] sm:$0xff]  }
   0x3   :  { %116 = vmatprep.subr.bf16.mxu0 %v134_v0  ;;  %27 = vperm.xlu0 %129, %v24_v4   ;;  %v15_v7 = vld [vmem:[%s180_s0] sm:$0xf] }
   0x6   :  { %117 = vmatpush3.bf16.msra.mxu0 %v131_v3 }
   0x7   :  { %118 = vmatprep.subr.bf16.mxu0 %v134_v0 }
   0xa   :  { %119 = vmatpush3.bf16.msra.mxu0 %v132_v5 }
   0xb   :  { %120 = vmatprep.subr.bf16.mxu0 %v134_v0 }
   0xe   :  { %121 = vmatpush3.bf16.msra.mxu0 %v133_v6 }
  0x11   :  { %123 = vmatmul.mubr.msk.bf16.vlgmr.msra.gmra.mxu0 %vm54_vm1, %v15_v7 }
  0x7e   :  { %v28_v8 = vpop.permute.xlu0 %27 }
  0xd1   :  { %v92_v9 = vpop.f32.mrf.mxu0 }
  0xd2   :  { %v93_v10 = vadd.f32 %v92_v9, %v28_v8 }
  0xd3   :  { %v124_v11 = vpop.f32.mrf.mxu0 }
  0xd4   :  { %99 = vst.msk [vmem:[%s181_s3] sm:$0xff] %vm98_vm2, %v93_v10 }
  0xd5   :  { %v95_v12 = vpop.f32.mrf.mxu0 }
  0xd7   :  { %v125_v13 = vpop.f32.mrf.mxu0 }

// kernel: cnn_ae_fmnist_forward.13
= control target key start
LH: loop header
LB: loop body
LE: loop exit
PB: predicated region body
PF: predicated region fallthrough
CT: control target
= control target key end

     0   :  { %vm38_vm0 = vcmask 261120   ;;  %v297_v2 = vmov 0   ;;  %vm148_vm1 = vcmask 130048   ;;  %vm246_vm2 = vcmask 15360   ;;  %s394_s0 = inlined_call_operand.vmem [shape: f32[32,2], index: 0, kind: input, shape index: {}]   ;;  %s395_s1 = inlined_call_operand.vmem [shape: f32[16,32], index: 1, kind: input, shape index: {}]   ;;  %s396_s2 = inlined_call_operand.vmem [shape: f32[16,1], index: 2, kind: input, shape index: {}]   ;;  %s397_s4 = inlined_call_operand.vmem [shape: f32[32,1], index: 4, kind: input, shape index: {}]   ;;  %s398_s3 = inlined_call_operand.vmem [shape: f32[32,16], index: 3, kind: input, shape index: {}]   ;;  %s399_s5 = inlined_call_operand.vmem [shape: f32[32,2], index: 5, kind: output, shape index: {}]  }
   0x1   :  { %v25_v0 = vld [vmem:[%s394_s0 + $0x18] sm:$0xff]  ;;  %v24_v1 = vld [vmem:[%s394_s0 + $0x10] sm:$0xff]  ;;  %295 = vset.pattern.permute.xlu0 %v297_v2  ;;  %296 = vset.pattern.permute.xlu1 %v297_v2  ;;  %v20_v3 = vld [vmem:[%s395_s1] sm:$0xff] }
   0x2   :  { %273 = vmatprep.subr.mxu0 %v25_v0  ;;  %v23_v4 = vld [vmem:[%s394_s0 + $0x8] sm:$0xff]  ;;  %281 = vmatprep.mubr.msk.f32.mxu0 %vm38_vm0, %v20_v3  ;;  %v22_v6 = vld [vmem:[%s394_s0] sm:$0xff]  ;;  %v126_v9 = vld [vmem:[%s397_s4 + $0x10] sm:$0xff] }
   0x3   :  { %274 = vmatpush3.msra.mxu0 %v25_v0  ;;  %v27_v5 = vld [vmem:[%s396_s2 + $0x8] sm:$0xff]  ;;  %v26_v7 = vld [vmem:[%s396_s2] sm:$0xff]  ;;  %v127_v13 = vld [vmem:[%s397_s4 + $0x18] sm:$0xff] }
   0x4   :  { %275 = vmatprep.subr.mxu0 %v24_v1  ;;  %35 = vperm.xlu0 %295, %v27_v5   ;;  %v21_v8 = vld [vmem:[%s395_s1 + $0x8] sm:$0xff]  ;;  %v120_v10 = vld [vmem:[%s398_s3] sm:$0xff]  ;;  %v122_v21 = vld [vmem:[%s398_s3 + $0x10] sm:$0xff] }
   0x5   :  { %276 = vmatpush3.msra.mxu0 %v24_v1  ;;  %288 = vmatprep.mubr.msk.f32.mxu1 %vm148_vm1, %v120_v10  ;;  %v124_v11 = vld [vmem:[%s397_s4] sm:$0xff]  ;;  %v125_v12 = vld [vmem:[%s397_s4 + $0x8] sm:$0xff]  ;;  %v123_v22 = vld [vmem:[%s398_s3 + $0x18] sm:$0xff] }
   0x6   :  { %277 = vmatprep.subr.mxu0 %v23_v4  ;;  %130 = vperm.xlu1 %296, %v124_v11   ;;  %v121_v20 = vld [vmem:[%s398_s3 + $0x8] sm:$0xff] }
   0x7   :  { %278 = vmatpush3.msra.mxu0 %v23_v4 }
   0x8   :  { %279 = vmatprep.subr.mxu0 %v22_v6  ;;  %30 = vperm.xlu0 %295, %v26_v7  }
   0x9   :  { %280 = vmatpush3.msra.mxu0 %v22_v6 }
   0xa   :  { %282 = vmatmul.mubr.msk.f32.vlgmr.msra.gmra.mxu0 %vm38_vm0, %v21_v8  ;;  %135 = vperm.xlu1 %296, %v125_v12  }
   0xc   :  { %140 = vperm.xlu0 %295, %v126_v9  }
   0xe   :  { %145 = vperm.xlu1 %296, %v127_v13  }
  0x7f   :  { %v36_v14 = vpop.permute.xlu0 %35 }
  0x81   :  { %v131_v23 = vpop.permute.xlu1 %130 }
  0x83   :  { %v31_v17 = vpop.permute.xlu0 %30 }
  0x85   :  { %v136_v24 = vpop.permute.xlu1 %135 }
  0x87   :  { %v141_v32 = vpop.permute.xlu0 %140 }
  0x89   :  { %v146_v29 = vpop.permute.xlu1 %145 }
  0xca   :  { %v283_v15 = vpop.f32.mrf.mxu0 }
  0xcb   :  { %v117_v16 = vadd.f32 %v283_v15, %v36_v14 }
  0xcc   :  { %v111_v18 = vpop.f32.mrf.mxu0 }
  0xcd   :  { %v112_v19 = vadd.f32 %v111_v18, %v31_v17  ;;  %284 = vmatprep.subr.mxu1 %v117_v16 }
  0xce   :  { %285 = vmatpush3.msra.mxu1 %v117_v16 }
  0xcf   :  { %286 = vmatprep.subr.mxu1 %v112_v19 }
  0xd0   :  { %287 = vmatpush3.msra.mxu1 %v112_v19 }
  0xd1   :  { %289 = vmatmul.mubr.msk.f32.vlgmr.msra.gmra.mxu1 %vm148_vm1, %v121_v20 }
  0xd2   :  { %291 = vmatprep.mubr.msk.f32.mxu1 %vm148_vm1, %v122_v21 }
  0xd5   :  { %292 = vmatmul.mubr.msk.f32.gmra.mxu1 %vm148_vm1, %v123_v22 }
 0x191   :  { %v290_v25 = vpop.f32.mrf.mxu1 }
 0x192   :  { %v233_v26 = vadd.f32 %v290_v25, %v136_v24 }
 0x193   :  { %v227_v27 = vpop.f32.mrf.mxu1 }
 0x194   :  { %248 = vst.msk [vmem:[%s399_s5 + $0x8] sm:$0xff] %vm246_vm2, %v233_v26  ;;  %v228_v28 = vadd.f32 %v227_v27, %v131_v23 }
 0x195   :  { %v293_v30 = vpop.f32.mrf.mxu1 }
 0x196   :  { %247 = vst.msk [vmem:[%s399_s5] sm:$0xff] %vm246_vm2, %v228_v28  ;;  %v243_v31 = vadd.f32 %v293_v30, %v146_v29 }
 0x197   :  { %v237_v33 = vpop.f32.mrf.mxu1 }
 0x198   :  { %250 = vst.msk [vmem:[%s399_s5 + $0x18] sm:$0xff] %vm246_vm2, %v243_v31  ;;  %v238_v34 = vadd.f32 %v237_v33, %v141_v32 }
 0x19a   :  { %249 = vst.msk [vmem:[%s399_s5 + $0x10] sm:$0xff] %vm246_vm2, %v238_v34 }

// kernel: cnn_ae_fmnist_forward.14
= control target key start
LH: loop header
LB: loop body
LE: loop exit
PB: predicated region body
PF: predicated region fallthrough
CT: control target
= control target key end

     0   :  { %v126_v0 = vmov 0.0   ;;  %vm127_vm0 = vmmov 0   ;;  %v128_v2 = vmov 0   ;;  %vm50_vm1 = vcmask 261120   ;;  %s170_s1 = inlined_call_operand.vmem [shape: bf16[32,8], index: 1, kind: input, shape index: {}]   ;;  %s171_s2 = inlined_call_operand.vmem [shape: f32[16,1], index: 2, kind: input, shape index: {}]   ;;  %s172_s0 = inlined_call_operand.vmem [shape: bf16[16,32], index: 0, kind: input, shape index: {}]   ;;  %s173_s3 = inlined_call_operand.vmem [shape: f32[16,8], index: 3, kind: output, shape index: {}]  }
   0x1   :  { %111 = vmatprep.subr.bf16.mxu0 %v126_v0  ;;  %v123_v1 = vld [vmem:[%s170_s1 + $0x8] sm:$0xff]   ;;  %115 = vmatprep.mubr.msk.bf16.mxu0 %vm127_vm0, %v126_v0  ;;  %v124_v3 = vld [vmem:[%s170_s1] sm:$0xff]   ;;  %vm97_vm2 = vcmask 64512  }
   0x2   :  { %122 = vset.pattern.permute.xlu0 %v128_v2  ;;  %112 = vmatpush3.bf16.msra.mxu0 %v123_v1  ;;  %v21_v4 = vld [vmem:[%s171_s2] sm:$0xff]  ;;  %v22_v6 = vld [vmem:[%s171_s2 + $0x8] sm:$0xff] }
   0x3   :  { %113 = vmatprep.subr.bf16.mxu0 %v126_v0  ;;  %25 = vperm.xlu0 %122, %v21_v4   ;;  %v125_v5 = vld [vmem:[%s172_s0] sm:$0xff]  }
   0x6   :  { %114 = vmatpush3.bf16.msra.mxu0 %v124_v3 }
   0x7   :  { %30 = vperm.xlu0 %122, %v22_v6  }
   0x9   :  { %116 = vmatmul.mubr.msk.bf16.vlgmr.msra.gmra.mxu0 %vm50_vm1, %v125_v5 }
  0x7e   :  { %v26_v7 = vpop.permute.xlu0 %25 }
  0x82   :  { %v31_v12 = vpop.permute.xlu0 %30 }
  0xc9   :  { %v88_v8 = vpop.f32.mrf.mxu0 }
  0xca   :  { %v89_v9 = vadd.f32 %v88_v8, %v26_v7 }
  0xcb   :  { %v117_v10 = vpop.f32.mrf.mxu0 }
  0xcc   :  { %v95_v11 = vmax.f32 %v89_v9, 0.0 }
  0xcd   :  { %v91_v13 = vpop.f32.mrf.mxu0 }
  0xce   :  { %98 = vst.msk [vmem:[%s173_s3] sm:$0xff] %vm97_vm2, %v95_v11  ;;  %v92_v14 = vadd.f32 %v91_v13, %v31_v12 }
  0xcf   :  { %v118_v15 = vpop.f32.mrf.mxu0 }
  0xd0   :  { %v96_v16 = vmax.f32 %v92_v14, 0.0 }
  0xd2   :  { %99 = vst.msk [vmem:[%s173_s3 + $0x8] sm:$0xff] %vm97_vm2, %v96_v16 }

// kernel: cnn_ae_fmnist_forward.15
= control target key start
LH: loop header
LB: loop body
LE: loop exit
PB: predicated region body
PF: predicated region fallthrough
CT: control target
= control target key end

     0   :  { %v1114_v1 = vmov 0   ;;  %s1399_s1 = inlined_call_operand.vmem [shape: bf16[1024,128], index: 1, kind: input, shape index: {}]   ;;  %s1400_s0 = inlined_call_operand.vmem [shape: bf16[32,1024], index: 0, kind: input, shape index: {}]   ;;  %s1401_s2 = inlined_call_operand.vmem [shape: f32[32,1], index: 2, kind: input, shape index: {}]   ;;  %s1402_s3 = inlined_call_operand.vmem [shape: f32[32,128], index: 3, kind: output, shape index: {}]  }
   0x1   :  { %v1050_v0 = vld [vmem:[%s1399_s1 + $0x78] sm:$0xff]   ;;  %1048 = vset.pattern.permute.xlu0 %v1114_v1  ;;  %1049 = vset.pattern.permute.xlu1 %v1114_v1  ;;  %v1054_v5 = vld [vmem:[%s1399_s1 + $0x70] sm:$0xff]   ;;  %v1058_v9 = vld [vmem:[%s1399_s1 + $0x68] sm:$0xff]  }
   0x2   :  { %v1051_v2 = vld [vmem:[%s1399_s1 + $0xf8] sm:$0xff]   ;;  %935 = vmatprep.subr.bf16.mxu0 %v1050_v0  ;;  %v1055_v6 = vld [vmem:[%s1399_s1 + $0xf0] sm:$0xff]   ;;  %v1059_v10 = vld [vmem:[%s1399_s1 + $0xe8] sm:$0xff]  }
   0x3   :  { %v1052_v3 = vld [vmem:[%s1399_s1 + $0x38] sm:$0xff]   ;;  %963 = vmatprep.subr.bf16.mxu1 %v1051_v2  ;;  %v1056_v7 = vld [vmem:[%s1399_s1 + $0x30] sm:$0xff]   ;;  %v1060_v11 = vld [vmem:[%s1399_s1 + $0x28] sm:$0xff]  }
   0x4   :  { %v1053_v4 = vld [vmem:[%s1399_s1 + $0xb8] sm:$0xff]   ;;  %936 = vmatpush3.bf16.msra.mxu0 %v1052_v3  ;;  %v1057_v8 = vld [vmem:[%s1399_s1 + $0xb0] sm:$0xff]   ;;  %v1061_v12 = vld [vmem:[%s1399_s1 + $0xa8] sm:$0xff]  }
   0x5   :  { %964 = vmatpush3.bf16.msra.mxu1 %v1053_v4  ;;  %937 = vmatprep.subr.bf16.mxu0 %v1054_v5  ;;  %v1062_v13 = vld [vmem:[%s1399_s1 + $0x60] sm:$0xff]   ;;  %v1066_v17 = vld [vmem:[%s1399_s1 + $0x58] sm:$0xff]   ;;  %v1070_v21 = vld [vmem:[%s1399_s1 + $0x50] sm:$0xff]  }
   0x6   :  { %965 = vmatprep.subr.bf16.mxu1 %v1055_v6  ;;  %v1063_v14 = vld [vmem:[%s1399_s1 + $0xe0] sm:$0xff]   ;;  %v1067_v18 = vld [vmem:[%s1399_s1 + $0xd8] sm:$0xff]   ;;  %v1071_v22 = vld [vmem:[%s1399_s1 + $0xd0] sm:$0xff]  }
   0x7   :  { %v1064_v15 = vld [vmem:[%s1399_s1 + $0x20] sm:$0xff]   ;;  %v1068_v19 = vld [vmem:[%s1399_s1 + $0x18] sm:$0xff]   ;;  %v1072_v23 = vld [vmem:[%s1399_s1 + $0x10] sm:$0xff]  }
   0x8   :  { %938 = vmatpush3.bf16.msra.mxu0 %v1056_v7  ;;  %v1065_v16 = vld [vmem:[%s1399_s1 + $0xa0] sm:$0xff]   ;;  %v1069_v20 = vld [vmem:[%s1399_s1 + $0x98] sm:$0xff]   ;;  %v1073_v24 = vld [vmem:[%s1399_s1 + $0x90] sm:$0xff]  }
   0x9   :  { %966 = vmatpush3.bf16.msra.mxu1 %v1057_v8  ;;  %939 = vmatprep.subr.bf16.mxu0 %v1058_v9  ;;  %v1074_v25 = vld [vmem:[%s1399_s1 + $0x48] sm:$0xff]   ;;  %v1078_v29 = vld [vmem:[%s1399_s1 + $0x40] sm:$0xff]   ;;  %v1082_v41 = vld [vmem:[%s1399_s1 + $0x178] sm:$0xff]  }
   0xa   :  { %967 = vmatprep.subr.bf16.mxu1 %v1059_v10  ;;  %v1075_v26 = vld [vmem:[%s1399_s1 + $0xc8] sm:$0xff]   ;;  %v1079_v30 = vld [vmem:[%s1399_s1 + $0xc0] sm:$0xff]   ;;  %v1083_v42 = vld [vmem:[%s1399_s1 + $0x1f8] sm:$0xff]  }
   0xb   :  { %v1076_v27 = vld [vmem:[%s1399_s1 + $0x8] sm:$0xff]   ;;  %v1080_v31 = vld [vmem:[%s1399_s1] sm:$0xff]   ;;  %v1084_v43 = vld [vmem:[%s1399_s1 + $0x138] sm:$0xff]  }
   0xc   :  { %940 = vmatpush3.bf16.msra.mxu0 %v1060_v11  ;;  %v1077_v28 = vld [vmem:[%s1399_s1 + $0x88] sm:$0xff]   ;;  %v1081_v32 = vld [vmem:[%s1399_s1 + $0x80] sm:$0xff]   ;;  %v1085_v44 = vld [vmem:[%s1399_s1 + $0x1b8] sm:$0xff]  }
   0xd   :  { %968 = vmatpush3.bf16.msra.mxu1 %v1061_v12  ;;  %941 = vmatprep.subr.bf16.mxu0 %v1062_v13  ;;  %v15_v33 = vld [vmem:[%s1400_s0] sm:$0xff]  ;;  %v16_v35 = vld [vmem:[%s1400_s0 + $0x8] sm:$0xff]  ;;  %v1086_v45 = vld [vmem:[%s1399_s1 + $0x170] sm:$0xff]  }
   0xe   :  { %969 = vmatprep.subr.bf16.mxu1 %v1063_v14  ;;  %v19_v34 = vld [vmem:[%s1400_s0 + $0x20] sm:$0xff]  ;;  %v20_v38 = vld [vmem:[%s1400_s0 + $0x28] sm:$0xff]  ;;  %v1087_v46 = vld [vmem:[%s1399_s1 + $0x1f0] sm:$0xff]  }
   0xf   :  { %v855_v36 = vcombine.low %v15_v33, %v19_v34  ;;  %v856_v37 = vcombine.high %v15_v33, %v19_v34  ;;  %v857_v39 = vcombine.low %v16_v35, %v20_v38  ;;  %v858_v40 = vcombine.high %v16_v35, %v20_v38  ;;  %v1088_v47 = vld [vmem:[%s1399_s1 + $0x130] sm:$0xff]   ;;  %v1090_v49 = vld [vmem:[%s1399_s1 + $0x168] sm:$0xff]   ;;  %v1094_v53 = vld [vmem:[%s1399_s1 + $0x160] sm:$0xff]  }
  0x10   :  { %942 = vmatpush3.bf16.msra.mxu0 %v1064_v15  ;;  %v1089_v48 = vld [vmem:[%s1399_s1 + $0x1b0] sm:$0xff]   ;;  %v1091_v50 = vld [vmem:[%s1399_s1 + $0x1e8] sm:$0xff]   ;;  %v1095_v54 = vld [vmem:[%s1399_s1 + $0x1e0] sm:$0xff]  }
  0x11   :  { %970 = vmatpush3.bf16.msra.mxu1 %v1065_v16  ;;  %943 = vmatprep.subr.bf16.mxu0 %v1066_v17  ;;  %v1092_v51 = vld [vmem:[%s1399_s1 + $0x128] sm:$0xff]   ;;  %v1096_v55 = vld [vmem:[%s1399_s1 + $0x120] sm:$0xff]   ;;  %v1098_v57 = vld [vmem:[%s1399_s1 + $0x158] sm:$0xff]  }
  0x12   :  { %971 = vmatprep.subr.bf16.mxu1 %v1067_v18  ;;  %679 = vmatprep.mubr.bf16.mxu0 %v856_v37  ;;  %v1093_v52 = vld [vmem:[%s1399_s1 + $0x1a8] sm:$0xff]   ;;  %v1097_v56 = vld [vmem:[%s1399_s1 + $0x1a0] sm:$0xff]   ;;  %v1099_v58 = vld [vmem:[%s1399_s1 + $0x1d8] sm:$0xff]  }
  0x13   :  { %728 = vmatprep.mubr.bf16.mxu1 %v858_v40  ;;  %v23_v59 = vld [vmem:[%s1400_s0 + $0x40] sm:$0xff]  ;;  %v1100_v62 = vld [vmem:[%s1399_s1 + $0x118] sm:$0xff]   ;;  %v24_v1 = vld [vmem:[%s1400_s0 + $0x48] sm:$0xff] }
  0x14   :  { %944 = vmatpush3.bf16.msra.mxu0 %v1068_v19  ;;  %v27_v60 = vld [vmem:[%s1400_s0 + $0x60] sm:$0xff]  ;;  %v1101_v0 = vld [vmem:[%s1399_s1 + $0x198] sm:$0xff]   ;;  %v28_v2 = vld [vmem:[%s1400_s0 + $0x68] sm:$0xff] }
  0x15   :  { %972 = vmatpush3.bf16.msra.mxu1 %v1069_v20  ;;  %945 = vmatprep.subr.bf16.mxu0 %v1070_v21  ;;  %v864_v61 = vcombine.high %v23_v59, %v27_v60  ;;  %v863_v63 = vcombine.low %v23_v59, %v27_v60  ;;  %v866_v3 = vcombine.high %v24_v1, %v28_v2  ;;  %v1102_v5 = vld [vmem:[%s1399_s1 + $0x150] sm:$0xff]   ;;  %v1106_v9 = vld [vmem:[%s1399_s1 + $0x148] sm:$0xff]   ;;  %v1110_v13 = vld [vmem:[%s1399_s1 + $0x140] sm:$0xff]  }
  0x16   :  { %973 = vmatprep.subr.bf16.mxu1 %v1071_v22  ;;  %v865_v4 = vcombine.low %v24_v1, %v28_v2  ;;  %v1103_v6 = vld [vmem:[%s1399_s1 + $0x1d0] sm:$0xff]   ;;  %v1107_v10 = vld [vmem:[%s1399_s1 + $0x1c8] sm:$0xff]   ;;  %v1111_v14 = vld [vmem:[%s1399_s1 + $0x1c0] sm:$0xff]  }
  0x17   :  { %v1104_v7 = vld [vmem:[%s1399_s1 + $0x110] sm:$0xff]   ;;  %v1108_v11 = vld [vmem:[%s1399_s1 + $0x108] sm:$0xff]   ;;  %v1112_v15 = vld [vmem:[%s1399_s1 + $0x100] sm:$0xff]  }
  0x18   :  { %946 = vmatpush3.bf16.msra.mxu0 %v1072_v23  ;;  %v1105_v8 = vld [vmem:[%s1399_s1 + $0x190] sm:$0xff]   ;;  %v1109_v12 = vld [vmem:[%s1399_s1 + $0x188] sm:$0xff]   ;;  %v1113_v16 = vld [vmem:[%s1399_s1 + $0x180] sm:$0xff]  }
  0x19   :  { %974 = vmatpush3.bf16.msra.mxu1 %v1073_v24  ;;  %947 = vmatprep.subr.bf16.mxu0 %v1074_v25  ;;  %v17_v17 = vld [vmem:[%s1400_s0 + $0x10] sm:$0xff]  ;;  %v18_v19 = vld [vmem:[%s1400_s0 + $0x18] sm:$0xff]  ;;  %v160_v33 = vld [vmem:[%s1401_s2 + $0x8] sm:$0xff] }
  0x1a   :  { %975 = vmatprep.subr.bf16.mxu1 %v1075_v26  ;;  %v21_v18 = vld [vmem:[%s1400_s0 + $0x30] sm:$0xff]  ;;  %v22_v20 = vld [vmem:[%s1400_s0 + $0x38] sm:$0xff] }
  0x1b   :  { %v859_v21 = vcombine.low %v17_v17, %v21_v18  ;;  %v860_v22 = vcombine.high %v17_v17, %v21_v18  ;;  %v861_v23 = vcombine.low %v18_v19, %v22_v20  ;;  %v862_v24 = vcombine.high %v18_v19, %v22_v20  ;;  %v25_v25 = vld [vmem:[%s1400_s0 + $0x50] sm:$0xff]  ;;  %v162_v34 = vld [vmem:[%s1401_s2 + $0x18] sm:$0xff] }
  0x1c   :  { %948 = vmatpush3.bf16.msra.mxu0 %v1076_v27  ;;  %v29_v26 = vld [vmem:[%s1400_s0 + $0x70] sm:$0xff]  ;;  %v26_v27 = vld [vmem:[%s1400_s0 + $0x58] sm:$0xff] }
  0x1d   :  { %976 = vmatpush3.bf16.msra.mxu1 %v1077_v28  ;;  %949 = vmatprep.subr.bf16.mxu0 %v1078_v29  ;;  %v868_v28 = vcombine.high %v25_v25, %v29_v26  ;;  %v30_v29 = vld [vmem:[%s1400_s0 + $0x78] sm:$0xff]  ;;  %v867_v35 = vcombine.low %v25_v25, %v29_v26 }
  0x1e   :  { %977 = vmatprep.subr.bf16.mxu1 %v1079_v30  ;;  %v870_v30 = vcombine.high %v26_v27, %v30_v29 }
  0x20   :  { %950 = vmatpush3.bf16.msra.mxu0 %v1080_v31  ;;  %v159_v31 = vld [vmem:[%s1401_s2] sm:$0xff] }
  0x21   :  { %978 = vmatpush3.bf16.msra.mxu1 %v1081_v32  ;;  %991 = vmatprep.subr.bf16.mxu0 %v1082_v41  ;;  %v161_v32 = vld [vmem:[%s1401_s2 + $0x10] sm:$0xff] }
  0x22   :  { %1019 = vmatprep.subr.bf16.mxu1 %v1083_v42  ;;  %165 = vperm.xlu0 %1048, %v159_v31  }
  0x23   :  { %680 = vmatmul.mubr.bf16.vlgmr.msra.gmra.mxu0 %v855_v36  ;;  %175 = vperm.xlu1 %1049, %v161_v32   ;;  %v869_v36 = vcombine.low %v26_v27, %v30_v29 }
  0x24   :  { %729 = vmatmul.mubr.bf16.vlgmr.msra.gmra.mxu1 %v857_v39  ;;  %992 = vmatpush3.bf16.msra.mxu0 %v1084_v43 }
  0x25   :  { %1020 = vmatpush3.bf16.msra.mxu1 %v1085_v44  ;;  %993 = vmatprep.subr.bf16.mxu0 %v1086_v45 }
  0x26   :  { %1021 = vmatprep.subr.bf16.mxu1 %v1087_v46  ;;  %687 = vmatprep.mubr.bf16.mxu0 %v864_v61 }
  0x27   :  { %736 = vmatprep.mubr.bf16.mxu1 %v866_v3  ;;  %170 = vperm.xlu0 %1048, %v160_v33  }
  0x28   :  { %994 = vmatpush3.bf16.msra.mxu0 %v1088_v47  ;;  %180 = vperm.xlu1 %1049, %v162_v34  }
  0x29   :  { %1022 = vmatpush3.bf16.msra.mxu1 %v1089_v48  ;;  %995 = vmatprep.subr.bf16.mxu0 %v1090_v49 }
  0x2a   :  { %1023 = vmatprep.subr.bf16.mxu1 %v1091_v50 }
  0x2b   :  { %688 = vmatmul.mubr.bf16.gmra.mxu0 %v863_v63 }
  0x2c   :  { %996 = vmatpush3.bf16.msra.mxu0 %v1092_v51  ;;  %737 = vmatmul.mubr.bf16.gmra.mxu1 %v865_v4 }
  0x2d   :  { %1024 = vmatpush3.bf16.msra.mxu1 %v1093_v52  ;;  %997 = vmatprep.subr.bf16.mxu0 %v1094_v53 }
  0x2e   :  { %1025 = vmatprep.subr.bf16.mxu1 %v1095_v54  ;;  %777 = vmatprep.mubr.bf16.mxu0 %v860_v22 }
  0x2f   :  { %826 = vmatprep.mubr.bf16.mxu1 %v862_v24 }
  0x30   :  { %998 = vmatpush3.bf16.msra.mxu0 %v1096_v55 }
  0x31   :  { %1026 = vmatpush3.bf16.msra.mxu1 %v1097_v56  ;;  %999 = vmatprep.subr.bf16.mxu0 %v1098_v57 }
  0x32   :  { %1027 = vmatprep.subr.bf16.mxu1 %v1099_v58 }
  0x34   :  { %1000 = vmatpush3.bf16.msra.mxu0 %v1100_v62 }
  0x35   :  { %1028 = vmatpush3.bf16.msra.mxu1 %v1101_v0  ;;  %1001 = vmatprep.subr.bf16.mxu0 %v1102_v5 }
  0x36   :  { %1029 = vmatprep.subr.bf16.mxu1 %v1103_v6 }
  0x38   :  { %1002 = vmatpush3.bf16.msra.mxu0 %v1104_v7 }
  0x39   :  { %1030 = vmatpush3.bf16.msra.mxu1 %v1105_v8  ;;  %1003 = vmatprep.subr.bf16.mxu0 %v1106_v9 }
  0x3a   :  { %1031 = vmatprep.subr.bf16.mxu1 %v1107_v10 }
  0x3c   :  { %1004 = vmatpush3.bf16.msra.mxu0 %v1108_v11 }
  0x3d   :  { %1032 = vmatpush3.bf16.msra.mxu1 %v1109_v12  ;;  %1005 = vmatprep.subr.bf16.mxu0 %v1110_v13 }
  0x3e   :  { %1033 = vmatprep.subr.bf16.mxu1 %v1111_v14 }
  0x40   :  { %1006 = vmatpush3.bf16.msra.mxu0 %v1112_v15 }
  0x41   :  { %1034 = vmatpush3.bf16.msra.mxu1 %v1113_v16 }
  0x43   :  { %778 = vmatmul.mubr.bf16.vlgmr.msra.gmra.mxu0 %v859_v21 }
  0x44   :  { %827 = vmatmul.mubr.bf16.vlgmr.msra.gmra.mxu1 %v861_v23  ;;  %785 = vmatprep.mubr.bf16.mxu0 %v868_v28 }
  0x45   :  { %834 = vmatprep.mubr.bf16.mxu1 %v870_v30 }
  0x4b   :  { %786 = vmatmul.mubr.bf16.gmra.mxu0 %v867_v35 }
  0x4c   :  { %835 = vmatmul.mubr.bf16.gmra.mxu1 %v869_v36 }
  0x9d   :  { %v166_v49 = vpop.permute.xlu0 %165 }
  0x9e   :  { %v176_v61 = vpop.permute.xlu1 %175 }
  0xa2   :  { %v171_v58 = vpop.permute.xlu0 %170 }
  0xa3   :  { %v181_v15 = vpop.permute.xlu1 %180 }
  0xe3   :  { %v951_v37 = vpop.f32.mrf.mxu0 }
  0xe4   :  { %v979_v38 = vpop.f32.mrf.mxu1 }
  0xe5   :  { %v952_v39 = vpop.f32.mrf.mxu0 }
  0xe6   :  { %v980_v40 = vpop.f32.mrf.mxu1  ;;  %v953_v52 = vadd.f32 %v952_v39, %v951_v37 }
  0xe7   :  { %v954_v41 = vpop.f32.mrf.mxu0  ;;  %v981_v55 = vadd.f32 %v980_v40, %v979_v38 }
  0xe8   :  { %v982_v42 = vpop.f32.mrf.mxu1  ;;  %v682_v56 = vadd.f32 %v953_v52, %v166_v49 }
  0xe9   :  { %v955_v43 = vpop.f32.mrf.mxu0 }
  0xea   :  { %v983_v44 = vpop.f32.mrf.mxu1  ;;  %v956_v57 = vadd.f32 %v955_v43, %v954_v41  ;;  %v731_v1 = vadd.f32 %v981_v55, %v682_v56 }
  0xeb   :  { %v957_v45 = vpop.f32.mrf.mxu0  ;;  %v984_v6 = vadd.f32 %v983_v44, %v982_v42 }
  0xec   :  { %v985_v46 = vpop.f32.mrf.mxu1  ;;  %v685_v2 = vadd.f32 %v956_v57, %v171_v58 }
  0xed   :  { %v958_v47 = vpop.f32.mrf.mxu0 }
  0xee   :  { %v986_v48 = vpop.f32.mrf.mxu1  ;;  %v959_v62 = vadd.f32 %v958_v47, %v957_v45  ;;  %v734_v13 = vadd.f32 %v984_v6, %v685_v2 }
  0xef   :  { %v960_v50 = vpop.f32.mrf.mxu0  ;;  %v987_v10 = vadd.f32 %v986_v48, %v985_v46 }
  0xf0   :  { %v988_v51 = vpop.f32.mrf.mxu1  ;;  %v690_v9 = vadd.f32 %v959_v62, %v176_v61 }
  0xf1   :  { %v961_v53 = vpop.f32.mrf.mxu0 }
  0xf2   :  { %v989_v54 = vpop.f32.mrf.mxu1  ;;  %v962_v14 = vadd.f32 %v961_v53, %v960_v50  ;;  %v739_v23 = vadd.f32 %v987_v10, %v690_v9 }
  0xf3   :  { %v990_v27 = vadd.f32 %v989_v54, %v988_v51 }
  0xf4   :  { %v693_v26 = vadd.f32 %v962_v14, %v181_v15 }
  0xf6   :  { %v742_v37 = vadd.f32 %v990_v27, %v693_v26 }
 0x103   :  { %v1007_v59 = vpop.f32.mrf.mxu0 }
 0x104   :  { %v1035_v60 = vpop.f32.mrf.mxu1 }
 0x105   :  { %v1008_v63 = vpop.f32.mrf.mxu0 }
 0x106   :  { %v1036_v0 = vpop.f32.mrf.mxu1  ;;  %v1009_v3 = vadd.f32 %v1008_v63, %v1007_v59 }
 0x107   :  { %v1010_v4 = vpop.f32.mrf.mxu0  ;;  %v1037_v8 = vadd.f32 %v1036_v0, %v1035_v60 }
 0x108   :  { %v1038_v5 = vpop.f32.mrf.mxu1  ;;  %v780_v7 = vadd.f32 %v1009_v3, %v731_v1 }
 0x109   :  { %v1011_v11 = vpop.f32.mrf.mxu0 }
 0x10a   :  { %v1039_v12 = vpop.f32.mrf.mxu1  ;;  %v829_v16 = vadd.f32 %v1037_v8, %v780_v7  ;;  %v1012_v17 = vadd.f32 %v1011_v11, %v1010_v4 }
 0x10b   :  { %v1013_v18 = vpop.f32.mrf.mxu0  ;;  %v1040_v22 = vadd.f32 %v1039_v12, %v1038_v5 }
 0x10c   :  { %v1041_v19 = vpop.f32.mrf.mxu1  ;;  %v843_v20 = vmax.f32 %v829_v16, 0.0  ;;  %v783_v21 = vadd.f32 %v1012_v17, %v734_v13 }
 0x10d   :  { %v1014_v24 = vpop.f32.mrf.mxu0 }
 0x10e   :  { %v1042_v25 = vpop.f32.mrf.mxu1  ;;  %847 = vst [vmem:[%s1402_s3] sm:$0xff] %v843_v20  ;;  %v832_v28 = vadd.f32 %v1040_v22, %v783_v21  ;;  %v1015_v29 = vadd.f32 %v1014_v24, %v1013_v18 }
 0x10f   :  { %v1016_v30 = vpop.f32.mrf.mxu0  ;;  %v1043_v34 = vadd.f32 %v1042_v25, %v1041_v19 }
 0x110   :  { %v1044_v31 = vpop.f32.mrf.mxu1  ;;  %v844_v32 = vmax.f32 %v832_v28, 0.0  ;;  %v788_v33 = vadd.f32 %v1015_v29, %v739_v23 }
 0x111   :  { %v1017_v35 = vpop.f32.mrf.mxu0 }
 0x112   :  { %v1045_v36 = vpop.f32.mrf.mxu1  ;;  %848 = vst [vmem:[%s1402_s3 + $0x8] sm:$0xff] %v844_v32  ;;  %v837_v38 = vadd.f32 %v1043_v34, %v788_v33  ;;  %v1018_v39 = vadd.f32 %v1017_v35, %v1016_v30 }
 0x113   :  { %v1046_v42 = vadd.f32 %v1045_v36, %v1044_v31 }
 0x114   :  { %v845_v40 = vmax.f32 %v837_v38, 0.0  ;;  %v791_v41 = vadd.f32 %v1018_v39, %v742_v37 }
 0x116   :  { %849 = vst [vmem:[%s1402_s3 + $0x10] sm:$0xff] %v845_v40  ;;  %v840_v43 = vadd.f32 %v1046_v42, %v791_v41 }
 0x118   :  { %v846_v44 = vmax.f32 %v840_v43, 0.0 }
 0x11a   :  { %850 = vst [vmem:[%s1402_s3 + $0x18] sm:$0xff] %v846_v44 }

// kernel: cnn_ae_fmnist_forward.16
= control target key start
LH: loop header
LB: loop body
LE: loop exit
PB: predicated region body
PF: predicated region fallthrough
CT: control target
= control target key end

     0   :  { %v865_v1 = vmov 0   ;;  %vm478_vm0 = vcmask 261120   ;;  %s1150_s1 = inlined_call_operand.vmem [shape: bf16[288,512], index: 1, kind: input, shape index: {}]   ;;  %s1151_s0 = inlined_call_operand.vmem [shape: bf16[16,288], index: 0, kind: input, shape index: {}]   ;;  %s1152_s2 = inlined_call_operand.vmem [shape: f32[16,1], index: 2, kind: input, shape index: {}]   ;;  %s1153_s3 = inlined_call_operand.vmem [shape: f32[16,512], index: 3, kind: output, shape index: {}]  }
   0x1   :  { %v753_v0 = vld [vmem:[%s1150_s1 + $0xe4] ss:$16 sps:$4 sm:$0xff]   ;;  %557 = vmatprep.mubr.bf16.mxu1 %v865_v1  ;;  %752 = vset.pattern.permute.xlu0 %v865_v1  ;;  %v757_v3 = vld [vmem:[%s1150_s1 + $0xe0] ss:$16 sps:$4 sm:$0xff]   ;;  %v768_v11 = vld [vmem:[%s1150_s1 + $0xe8] ss:$16 sps:$4 sm:$0xff]  }
   0x2   :  { %v755_v2 = vld [vmem:[%s1150_s1 + $0x224] ss:$16 sps:$4 sm:$0xff]   ;;  %482 = vmatprep.subr.bf16.mxu0 %v753_v0  ;;  %v758_v4 = vld [vmem:[%s1150_s1 + $0x220] ss:$16 sps:$4 sm:$0xff]   ;;  %v770_v12 = vld [vmem:[%s1150_s1 + $0xec] ss:$16 sps:$4 sm:$0xff]  }
   0x3   :  { %537 = vmatprep.subr.bf16.mxu1 %v755_v2  ;;  %v759_v5 = vld [vmem:[%s1150_s1 + $0xc4] ss:$16 sps:$4 sm:$0xff]   ;;  %483 = vmatpush1.bf16.msra.mxu0 %v757_v3  ;;  %v763_v7 = vld [vmem:[%s1150_s1 + $0xc0] ss:$16 sps:$4 sm:$0xff]   ;;  %v774_v15 = vld [vmem:[%s1150_s1 + $0xc8] ss:$16 sps:$4 sm:$0xff]  }
   0x4   :  { %538 = vmatpush1.bf16.msra.mxu1 %v758_v4  ;;  %v761_v6 = vld [vmem:[%s1150_s1 + $0x204] ss:$16 sps:$4 sm:$0xff]   ;;  %484 = vmatprep.subr.bf16.mxu0 %v759_v5  ;;  %v764_v8 = vld [vmem:[%s1150_s1 + $0x200] ss:$16 sps:$4 sm:$0xff]   ;;  %v776_v16 = vld [vmem:[%s1150_s1 + $0xcc] ss:$16 sps:$4 sm:$0xff]  }
   0x5   :  { %539 = vmatprep.subr.bf16.mxu1 %v761_v6  ;;  %v765_v9 = vld [vmem:[%s1150_s1 + $0xa4] ss:$16 sps:$4 sm:$0xff]   ;;  %v771_v13 = vld [vmem:[%s1150_s1 + $0xa0] ss:$16 sps:$4 sm:$0xff]   ;;  %v782_v19 = vld [vmem:[%s1150_s1 + $0xac] ss:$16 sps:$4 sm:$0xff]  }
   0x6   :  { %v918_v10 = vld [vmem:[%s1151_s0 + $0x8] ss:$12 sps:$4 sm:$0xff]   ;;  %v777_v17 = vld [vmem:[%s1150_s1 + $0x80] ss:$16 sps:$4 sm:$0xff]   ;;  %v788_v23 = vld [vmem:[%s1150_s1 + $0x8c] ss:$16 sps:$4 sm:$0xff]  }
   0x7   :  { %485 = vmatpush1.bf16.msra.mxu0 %v763_v7  ;;  %v772_v14 = vld [vmem:[%s1150_s1 + $0x84] ss:$16 sps:$4 sm:$0xff]   ;;  %v780_v20 = vld [vmem:[%s1150_s1 + $0xa8] ss:$16 sps:$4 sm:$0xff]   ;;  %v783_v21 = vld [vmem:[%s1150_s1 + $0x60] ss:$16 sps:$4 sm:$0xff]  }
   0x8   :  { %540 = vmatpush1.bf16.msra.mxu1 %v764_v8  ;;  %486 = vmatprep.subr.bf16.mxu0 %v765_v9  ;;  %v778_v18 = vld [vmem:[%s1150_s1 + $0x64] ss:$16 sps:$4 sm:$0xff]   ;;  %v786_v24 = vld [vmem:[%s1150_s1 + $0x88] ss:$16 sps:$4 sm:$0xff]   ;;  %v789_v25 = vld [vmem:[%s1150_s1 + $0x40] ss:$16 sps:$4 sm:$0xff]  }
   0x9   :  { %568 = vmatprep.subr.bf16.mxu1 %v770_v12  ;;  %v784_v22 = vld [vmem:[%s1150_s1 + $0x44] ss:$16 sps:$4 sm:$0xff]   ;;  %v794_v27 = vld [vmem:[%s1150_s1 + $0x6c] ss:$16 sps:$4 sm:$0xff]   ;;  %v792_v28 = vld [vmem:[%s1150_s1 + $0x68] ss:$16 sps:$4 sm:$0xff]  }
   0xa   :  { %v790_v26 = vld [vmem:[%s1150_s1 + $0x24] ss:$16 sps:$4 sm:$0xff]   ;;  %v795_v29 = vld [vmem:[%s1150_s1 + $0x20] ss:$16 sps:$4 sm:$0xff]   ;;  %v800_v31 = vld [vmem:[%s1150_s1 + $0x4c] ss:$16 sps:$4 sm:$0xff]  }
   0xb   :  { %749 = vmatmul.mubr.msk.bf16.vlgmr.msra.gmra.mxu1 %vm478_vm0, %v918_v10  ;;  %487 = vmatpush1.bf16.msra.mxu0 %v771_v13  ;;  %v796_v30 = vld [vmem:[%s1150_s1 + $0x4] ss:$16 sps:$4 sm:$0xff]   ;;  %v798_v32 = vld [vmem:[%s1150_s1 + $0x48] ss:$16 sps:$4 sm:$0xff]   ;;  %v801_v33 = vld [vmem:[%s1150_s1] ss:$16 sps:$4 sm:$0xff]  }
   0xc   :  { %569 = vmatpush1.bf16.msra.mxu1 %v768_v11  ;;  %488 = vmatprep.subr.bf16.mxu0 %v772_v14  ;;  %v802_v34 = vld [vmem:[%s1150_s1 + $0x1e4] ss:$16 sps:$4 sm:$0xff]   ;;  %v806_v35 = vld [vmem:[%s1150_s1 + $0x2c] ss:$16 sps:$4 sm:$0xff]   ;;  %v804_v36 = vld [vmem:[%s1150_s1 + $0x28] ss:$16 sps:$4 sm:$0xff]  }
   0xd   :  { %570 = vmatprep.subr.bf16.mxu1 %v776_v16  ;;  %v807_v37 = vld [vmem:[%s1150_s1 + $0x1e0] ss:$16 sps:$4 sm:$0xff]   ;;  %v808_v38 = vld [vmem:[%s1150_s1 + $0x1c4] ss:$16 sps:$4 sm:$0xff]   ;;  %v812_v39 = vld [vmem:[%s1150_s1 + $0xc] ss:$16 sps:$4 sm:$0xff]  }
   0xe   :  { %v810_v40 = vld [vmem:[%s1150_s1 + $0x8] ss:$16 sps:$4 sm:$0xff]   ;;  %v813_v41 = vld [vmem:[%s1150_s1 + $0x1c0] ss:$16 sps:$4 sm:$0xff]   ;;  %v814_v42 = vld [vmem:[%s1150_s1 + $0x1a4] ss:$16 sps:$4 sm:$0xff]  }
   0xf   :  { %489 = vmatpush1.bf16.msra.mxu0 %v777_v17  ;;  %v818_v43 = vld [vmem:[%s1150_s1 + $0x1ec] ss:$16 sps:$4 sm:$0xff]   ;;  %v816_v44 = vld [vmem:[%s1150_s1 + $0x1e8] ss:$16 sps:$4 sm:$0xff]   ;;  %v819_v45 = vld [vmem:[%s1150_s1 + $0x1a0] ss:$16 sps:$4 sm:$0xff]  }
  0x10   :  { %571 = vmatpush1.bf16.msra.mxu1 %v774_v15  ;;  %490 = vmatprep.subr.bf16.mxu0 %v778_v18  ;;  %v820_v46 = vld [vmem:[%s1150_s1 + $0x184] ss:$16 sps:$4 sm:$0xff]   ;;  %v824_v47 = vld [vmem:[%s1150_s1 + $0x1cc] ss:$16 sps:$4 sm:$0xff]   ;;  %v822_v48 = vld [vmem:[%s1150_s1 + $0x1c8] ss:$16 sps:$4 sm:$0xff]  }
  0x11   :  { %572 = vmatprep.subr.bf16.mxu1 %v782_v19  ;;  %v825_v49 = vld [vmem:[%s1150_s1 + $0x180] ss:$16 sps:$4 sm:$0xff]   ;;  %v826_v50 = vld [vmem:[%s1150_s1 + $0x164] ss:$16 sps:$4 sm:$0xff]   ;;  %v830_v52 = vld [vmem:[%s1150_s1 + $0x1ac] ss:$16 sps:$4 sm:$0xff]  }
  0x12   :  { %v852_v51 = vld [vmem:[%s1151_s0 + $0x4] ss:$12 sps:$4 sm:$0xff]   ;;  %v828_v53 = vld [vmem:[%s1150_s1 + $0x1a8] ss:$16 sps:$4 sm:$0xff]   ;;  %v836_v56 = vld [vmem:[%s1150_s1 + $0x18c] ss:$16 sps:$4 sm:$0xff]  }
  0x13   :  { %491 = vmatpush1.bf16.msra.mxu0 %v783_v21  ;;  %514 = vmatprep.mubr.bf16.mxu0 %v852_v51  ;;  %v831_v54 = vld [vmem:[%s1150_s1 + $0x160] ss:$16 sps:$4 sm:$0xff]   ;;  %v832_v55 = vld [vmem:[%s1150_s1 + $0x144] ss:$16 sps:$4 sm:$0xff]   ;;  %v834_v58 = vld [vmem:[%s1150_s1 + $0x188] ss:$16 sps:$4 sm:$0xff]  }
  0x14   :  { %573 = vmatpush1.bf16.msra.mxu1 %v780_v20  ;;  %492 = vmatprep.subr.bf16.mxu0 %v784_v22  ;;  %v91_v57 = vld [vmem:[%s1152_s2] sm:$0xff]  ;;  %v92_v60 = vld [vmem:[%s1152_s2 + $0x8] sm:$0xff] }
  0x15   :  { %574 = vmatprep.subr.bf16.mxu1 %v788_v23  ;;  %600 = vmatprep.mubr.bf16.mxu1 %v852_v51  ;;  %v837_v59 = vld [vmem:[%s1150_s1 + $0x140] ss:$16 sps:$4 sm:$0xff]   ;;  %v838_v61 = vld [vmem:[%s1150_s1 + $0x124] ss:$16 sps:$4 sm:$0xff]   ;;  %v842_v62 = vld [vmem:[%s1150_s1 + $0x16c] ss:$16 sps:$4 sm:$0xff]  }
  0x16   :  { %95 = vperm.xlu0 %752, %v91_v57   ;;  %v840_v63 = vld [vmem:[%s1150_s1 + $0x168] ss:$16 sps:$4 sm:$0xff]   ;;  %v843_v0 = vld [vmem:[%s1150_s1 + $0x120] ss:$16 sps:$4 sm:$0xff]   ;;  %v844_v2 = vld [vmem:[%s1150_s1 + $0x104] ss:$16 sps:$4 sm:$0xff]  }
  0x17   :  { %493 = vmatpush1.bf16.msra.mxu0 %v789_v25  ;;  %v848_v3 = vld [vmem:[%s1150_s1 + $0x14c] ss:$16 sps:$4 sm:$0xff]   ;;  %v846_v4 = vld [vmem:[%s1150_s1 + $0x148] ss:$16 sps:$4 sm:$0xff]   ;;  %v849_v5 = vld [vmem:[%s1150_s1 + $0x100] ss:$16 sps:$4 sm:$0xff]  }
  0x18   :  { %575 = vmatpush1.bf16.msra.mxu1 %v786_v24  ;;  %494 = vmatprep.subr.bf16.mxu0 %v790_v26  ;;  %v855_v6 = vld [vmem:[%s1150_s1 + $0x12c] ss:$16 sps:$4 sm:$0xff]   ;;  %v853_v9 = vld [vmem:[%s1150_s1 + $0x128] ss:$16 sps:$4 sm:$0xff]  }
  0x19   :  { %576 = vmatprep.subr.bf16.mxu1 %v794_v27  ;;  %v858_v7 = vld [vmem:[%s1150_s1 + $0x22c] ss:$16 sps:$4 sm:$0xff]   ;;  %v856_v11 = vld [vmem:[%s1150_s1 + $0x228] ss:$16 sps:$4 sm:$0xff]  }
  0x1a   :  { %100 = vperm.xlu0 %752, %v92_v60   ;;  %v850_v8 = vld [vmem:[%s1151_s0] ss:$12 sps:$4 sm:$0xff]   ;;  %v859_v14 = vld [vmem:[%s1150_s1 + $0x108] ss:$16 sps:$4 sm:$0xff]  }
  0x1b   :  { %495 = vmatpush1.bf16.msra.mxu0 %v795_v29  ;;  %v861_v12 = vld [vmem:[%s1150_s1 + $0x10c] ss:$16 sps:$4 sm:$0xff]   ;;  %v862_v15 = vld [vmem:[%s1150_s1 + $0x208] ss:$16 sps:$4 sm:$0xff]  }
  0x1c   :  { %577 = vmatpush1.bf16.msra.mxu1 %v792_v28  ;;  %496 = vmatprep.subr.bf16.mxu0 %v796_v30  ;;  %v864_v13 = vld [vmem:[%s1150_s1 + $0x20c] ss:$16 sps:$4 sm:$0xff]  }
  0x1d   :  { %578 = vmatprep.subr.bf16.mxu1 %v800_v31 }
  0x1f   :  { %497 = vmatpush1.bf16.msra.mxu0 %v801_v33 }
  0x20   :  { %579 = vmatpush1.bf16.msra.mxu1 %v798_v32  ;;  %498 = vmatprep.subr.bf16.mxu0 %v802_v34 }
  0x21   :  { %580 = vmatprep.subr.bf16.mxu1 %v806_v35 }
  0x23   :  { %499 = vmatpush2.bf16.msra.mxu0 %v807_v37 }
  0x24   :  { %581 = vmatpush1.bf16.msra.mxu1 %v804_v36  ;;  %500 = vmatprep.subr.bf16.mxu0 %v808_v38 }
  0x25   :  { %582 = vmatprep.subr.bf16.mxu1 %v812_v39 }
  0x27   :  { %501 = vmatpush2.bf16.msra.mxu0 %v813_v41 }
  0x28   :  { %583 = vmatpush1.bf16.msra.mxu1 %v810_v40  ;;  %502 = vmatprep.subr.bf16.mxu0 %v814_v42 }
  0x29   :  { %584 = vmatprep.subr.bf16.mxu1 %v818_v43 }
  0x2b   :  { %503 = vmatpush2.bf16.msra.mxu0 %v819_v45 }
  0x2c   :  { %585 = vmatpush2.bf16.msra.mxu1 %v816_v44  ;;  %504 = vmatprep.subr.bf16.mxu0 %v820_v46 }
  0x2d   :  { %586 = vmatprep.subr.bf16.mxu1 %v824_v47 }
  0x2f   :  { %505 = vmatpush2.bf16.msra.mxu0 %v825_v49 }
  0x30   :  { %587 = vmatpush2.bf16.msra.mxu1 %v822_v48  ;;  %506 = vmatprep.subr.bf16.mxu0 %v826_v50 }
  0x31   :  { %588 = vmatprep.subr.bf16.mxu1 %v830_v52 }
  0x33   :  { %507 = vmatpush2.bf16.msra.mxu0 %v831_v54 }
  0x34   :  { %589 = vmatpush2.bf16.msra.mxu1 %v828_v53  ;;  %508 = vmatprep.subr.bf16.mxu0 %v832_v55 }
  0x35   :  { %590 = vmatprep.subr.bf16.mxu1 %v836_v56 }
  0x37   :  { %509 = vmatpush2.bf16.msra.mxu0 %v837_v59 }
  0x38   :  { %591 = vmatpush2.bf16.msra.mxu1 %v834_v58  ;;  %510 = vmatprep.subr.bf16.mxu0 %v838_v61 }
  0x39   :  { %592 = vmatprep.subr.bf16.mxu1 %v842_v62 }
  0x3b   :  { %511 = vmatpush2.bf16.msra.mxu0 %v843_v0 }
  0x3c   :  { %593 = vmatpush2.bf16.msra.mxu1 %v840_v63  ;;  %512 = vmatprep.subr.bf16.mxu0 %v844_v2 }
  0x3d   :  { %594 = vmatprep.subr.bf16.mxu1 %v848_v3 }
  0x3f   :  { %513 = vmatpush2.bf16.msra.mxu0 %v849_v5 }
  0x40   :  { %595 = vmatpush2.bf16.msra.mxu1 %v846_v4  ;;  %623 = vmatprep.subr.bf16.mxu0 %v858_v7 }
  0x41   :  { %596 = vmatprep.subr.bf16.mxu1 %v855_v6 }
  0x42   :  { %515 = vmatmul.mubr.bf16.vlgmr.msra.gmra.mxu0 %v850_v8 }
  0x43   :  { %624 = vmatpush1.bf16.msra.mxu0 %v856_v11  ;;  %643 = vmatprep.mubr.bf16.mxu0 %v865_v1 }
  0x44   :  { %597 = vmatpush2.bf16.msra.mxu1 %v853_v9  ;;  %625 = vmatprep.subr.bf16.mxu0 %v864_v13 }
  0x45   :  { %598 = vmatprep.subr.bf16.mxu1 %v861_v12 }
  0x47   :  { %626 = vmatpush1.bf16.msra.mxu0 %v862_v15 }
  0x48   :  { %599 = vmatpush2.bf16.msra.mxu1 %v859_v14 }
  0x4a   :  { %750 = vmatmul.mubr.msk.bf16.vlgmr.msra.gmra.mxu0 %vm478_vm0, %v918_v10 }
  0x4b   :  { %601 = vmatmul.mubr.bf16.vlgmr.msra.gmra.mxu1 %v850_v8 }
  0x91   :  { %v96_v17 = vpop.permute.xlu0 %95 }
  0x95   :  { %v101_v21 = vpop.permute.xlu0 %100 }
  0xcb   :  { %v559_v16 = vpop.f32.mrf.mxu1 }
  0xcd   :  { %v561_v18 = vpop.f32.mrf.mxu1 }
  0xcf   :  { %v563_v22 = vpop.f32.mrf.mxu1 }
  0xd1   :  { %v565_v29 = vpop.f32.mrf.mxu1 }
 0x102   :  { %v516_v19 = vpop.f32.mrf.mxu0 }
 0x103   :  { %v517_v20 = vadd.f32 %v516_v19, %v96_v17 }
 0x104   :  { %v518_v23 = vpop.f32.mrf.mxu0 }
 0x105   :  { %v560_v24 = vadd.f32 %v559_v16, %v517_v20  ;;  %v519_v25 = vadd.f32 %v518_v23, %v96_v17 }
 0x106   :  { %v520_v26 = vpop.f32.mrf.mxu0 }
 0x107   :  { %v654_v27 = vmax.f32 %v560_v24, 0.0  ;;  %v562_v28 = vadd.f32 %v561_v18, %v519_v25  ;;  %v521_v1 = vadd.f32 %v520_v26, %v101_v21 }
 0x108   :  { %v522_v30 = vpop.f32.mrf.mxu0 }
 0x109   :  { %662 = vst [vmem:[%s1153_s3] sm:$0xff] %v654_v27  ;;  %v655_v10 = vmax.f32 %v562_v28, 0.0  ;;  %v564_v31 = vadd.f32 %v563_v22, %v521_v1  ;;  %v523_v32 = vadd.f32 %v522_v30, %v101_v21 }
 0x10a   :  { %v645_v34 = vpop.f32.mrf.mxu0 }
 0x10b   :  { %v602_v33 = vpop.f32.mrf.mxu1  ;;  %663 = vst [vmem:[%s1153_s3 + $0x8] sm:$0xff] %v655_v10  ;;  %v658_v35 = vmax.f32 %v564_v31, 0.0  ;;  %v566_v36 = vadd.f32 %v565_v29, %v523_v32 }
 0x10c   :  { %v603_v37 = vadd.f32 %v602_v33, %v96_v17  ;;  %v647_v39 = vpop.f32.mrf.mxu0 }
 0x10d   :  { %v604_v38 = vpop.f32.mrf.mxu1  ;;  %666 = vst [vmem:[%s1153_s3 + $0x20] sm:$0xff] %v658_v35  ;;  %v659_v40 = vmax.f32 %v566_v36, 0.0 }
 0x10e   :  { %v646_v41 = vadd.f32 %v645_v34, %v603_v37  ;;  %v605_v42 = vadd.f32 %v604_v38, %v96_v17  ;;  %v649_v44 = vpop.f32.mrf.mxu0 }
 0x10f   :  { %v606_v43 = vpop.f32.mrf.mxu1  ;;  %667 = vst [vmem:[%s1153_s3 + $0x28] sm:$0xff] %v659_v40 }
 0x110   :  { %v656_v45 = vmax.f32 %v646_v41, 0.0  ;;  %v648_v46 = vadd.f32 %v647_v39, %v605_v42  ;;  %v607_v47 = vadd.f32 %v606_v43, %v101_v21  ;;  %v651_v52 = vpop.f32.mrf.mxu0 }
 0x111   :  { %v608_v48 = vpop.f32.mrf.mxu1 }
 0x112   :  { %664 = vst [vmem:[%s1153_s3 + $0x10] sm:$0xff] %v656_v45  ;;  %v657_v49 = vmax.f32 %v648_v46, 0.0  ;;  %v650_v50 = vadd.f32 %v649_v44, %v607_v47  ;;  %v609_v51 = vadd.f32 %v608_v48, %v101_v21 }
 0x114   :  { %665 = vst [vmem:[%s1153_s3 + $0x18] sm:$0xff] %v657_v49  ;;  %v660_v53 = vmax.f32 %v650_v50, 0.0  ;;  %v652_v54 = vadd.f32 %v651_v52, %v609_v51 }
 0x116   :  { %668 = vst [vmem:[%s1153_s3 + $0x30] sm:$0xff] %v660_v53  ;;  %v661_v55 = vmax.f32 %v652_v54, 0.0 }
 0x118   :  { %669 = vst [vmem:[%s1153_s3 + $0x38] sm:$0xff] %v661_v55 }

// kernel: cnn_ae_fmnist_forward.17
= control target key start
LH: loop header
LB: loop body
LE: loop exit
PB: predicated region body
PF: predicated region fallthrough
CT: control target
= control target key end

     0   :  { %s1064_s0 = inlined_call_operand.vmem [shape: bf16[1,144], index: 0, kind: input, shape index: {}]   ;;  %s1065_s1 = inlined_call_operand.vmem [shape: bf16[144,2048], index: 1, kind: input, shape index: {}]   ;;  %s1066_s2 = inlined_call_operand.<no memory space> [shape: f32[1,1], index: 2, kind: input, shape index: {}]   ;;  %s1067_s3 = inlined_call_operand.vmem [shape: f32[1,2048], index: 3, kind: output, shape index: {}]  }
   0x1   :  { %v8_v0 = vstv %s1066_s2 }
   0x2   :  { %9 = vst [vmem:[#allocation2] sm:$0x1] %v8_v0 }
   0x3   :  { %s877_s14 = smov 0   ;;  %s879_s15 = smov 0  }
   0x4   :  { %s881_s16 = smov 0  }
   0x5 LB: > { %s695_s2 = sadd.s32 4294967295, %s850_s16   ;;  %s894_s17 = sadd.s32 1, %s850_s16   ;;  %s850_s16 = sphi %s881_s16, %s1070_s16   ;;  %s846_s15 = sphi %s879_s15, %s1069_s15   ;;  %s842_s14 = sphi %s877_s14, %s1068_s14  }
   0x6   : > { %s40_s18 = ssub.s32 %s850_s16, %s894_s17  ;;  %s43_s19 = sadd.s32 1, %s846_s15 }
   0x7   : > { %p41_p0 = scmp.eq.s32.totalorder %s40_s18, 0  ;;  %p50_p1 = scmp.ne.s32.totalorder %s846_s15, %s842_s14 }
   0x8   : > { %p51_p2 = scmp.eq.s32.totalorder %s850_s16, 0  ;;  %p698_p4 = scmp.ge.s32.totalorder %s850_s16, 4 }
   0x9   : > { %s903_s20 = scalar_select %p41_p0, %s846_s15, %s43_s19  }
   0xa   : > { %p52_p3 = por %p51_p2, %p50_p1  ;;  %129 = sbr.rel (%p698_p4) target bundleno = 37 (0x25), region = 24 }
   0xf   : > { %132 = sbr.rel (!%p52_p3) target bundleno = 37 (0x25), region = 28  ;;  %s134_s21 = sand.u32 (%p52_p3), 1, %s846_s15  }
  0x10   : > { %s744_s22 = sshll.u32 (%p52_p3), %s850_s16, 4  ;;  %s745_s23 = smul.u32 (%p52_p3), 288, %s134_s21 }
  0x11   : > { %s911_s26 = scalar_lea.vmem (%p52_p3), %s1065_s1, %s744_s22 }
  0x12   : > { %v152_v1 = vld [vmem:[%s911_s26] sm:$0xff] (%p52_p3)  ;;  %v154_v2 = vld [vmem:[%s911_s26 + $0x8] sm:$0xff] (%p52_p3)  ;;  %s919_s27 = scalar_lea.vmem (%p52_p3), [#allocation3], %s745_s23 }
  0x13   : > { %v156_v3 = vld [vmem:[%s911_s26 + $0x40] sm:$0xff] (%p52_p3)  ;;  %v158_v4 = vld [vmem:[%s911_s26 + $0x48] sm:$0xff] (%p52_p3)  ;;  %153 = vst [vmem:[%s919_s27] sm:$0xff] (%p52_p3), %v152_v1  ;;  %155 = vst [vmem:[%s919_s27 + $0x8] sm:$0xff] (%p52_p3), %v154_v2 }
  0x14   : > { %v160_v5 = vld [vmem:[%s911_s26 + $0x80] sm:$0xff]  ;;  %v162_v6 = vld [vmem:[%s911_s26 + $0x88] sm:$0xff]  ;;  %157 = vst [vmem:[%s919_s27 + $0x10] sm:$0xff] %v156_v3  ;;  %159 = vst [vmem:[%s919_s27 + $0x18] sm:$0xff] %v158_v4 }
  0x15   : > { %161 = vst [vmem:[%s919_s27 + $0x20] sm:$0xff] %v160_v5  ;;  %163 = vst [vmem:[%s919_s27 + $0x28] sm:$0xff] %v162_v6  ;;  %v164_v7 = vld [vmem:[%s911_s26 + $0xc0] sm:$0xff]  ;;  %v166_v8 = vld [vmem:[%s911_s26 + $0xc8] sm:$0xff] }
  0x16   : > { %v168_v9 = vld [vmem:[%s911_s26 + $0x100] sm:$0xff]  ;;  %165 = vst [vmem:[%s919_s27 + $0x30] sm:$0xff] %v164_v7  ;;  %167 = vst [vmem:[%s919_s27 + $0x38] sm:$0xff] %v166_v8  ;;  %v170_v10 = vld [vmem:[%s911_s26 + $0x108] sm:$0xff] }
  0x17   : > { %169 = vst [vmem:[%s919_s27 + $0x40] sm:$0xff] %v168_v9  ;;  %v172_v11 = vld [vmem:[%s911_s26 + $0x140] sm:$0xff]  ;;  %v174_v12 = vld [vmem:[%s911_s26 + $0x148] sm:$0xff]  ;;  %171 = vst [vmem:[%s919_s27 + $0x48] sm:$0xff] %v170_v10 }
  0x18   : > { %173 = vst [vmem:[%s919_s27 + $0x50] sm:$0xff] %v172_v11  ;;  %175 = vst [vmem:[%s919_s27 + $0x58] sm:$0xff] %v174_v12  ;;  %v176_v13 = vld [vmem:[%s911_s26 + $0x180] sm:$0xff]  ;;  %v178_v14 = vld [vmem:[%s911_s26 + $0x188] sm:$0xff] }
  0x19   : > { %v180_v15 = vld [vmem:[%s911_s26 + $0x1c0] sm:$0xff]  ;;  %177 = vst [vmem:[%s919_s27 + $0x60] sm:$0xff] %v176_v13  ;;  %179 = vst [vmem:[%s919_s27 + $0x68] sm:$0xff] %v178_v14  ;;  %v182_v16 = vld [vmem:[%s911_s26 + $0x1c8] sm:$0xff] }
  0x1a   : > { %181 = vst [vmem:[%s919_s27 + $0x70] sm:$0xff] %v180_v15  ;;  %v184_v17 = vld [vmem:[%s911_s26 + $0x200] sm:$0xff]  ;;  %v186_v18 = vld [vmem:[%s911_s26 + $0x208] sm:$0xff]  ;;  %183 = vst [vmem:[%s919_s27 + $0x78] sm:$0xff] %v182_v16 }
  0x1b   : > { %185 = vst [vmem:[%s919_s27 + $0x80] sm:$0xff] %v184_v17  ;;  %187 = vst [vmem:[%s919_s27 + $0x88] sm:$0xff] %v186_v18  ;;  %v188_v19 = vld [vmem:[%s911_s26 + $0x240] sm:$0xff]  ;;  %v190_v20 = vld [vmem:[%s911_s26 + $0x248] sm:$0xff] }
  0x1c   : > { %v192_v21 = vld [vmem:[%s911_s26 + $0x280] sm:$0xff]  ;;  %189 = vst [vmem:[%s919_s27 + $0x90] sm:$0xff] %v188_v19  ;;  %191 = vst [vmem:[%s919_s27 + $0x98] sm:$0xff] %v190_v20  ;;  %v194_v22 = vld [vmem:[%s911_s26 + $0x288] sm:$0xff] }
  0x1d   : > { %193 = vst [vmem:[%s919_s27 + $0xa0] sm:$0xff] %v192_v21  ;;  %v196_v23 = vld [vmem:[%s911_s26 + $0x2c0] sm:$0xff]  ;;  %v198_v24 = vld [vmem:[%s911_s26 + $0x2c8] sm:$0xff]  ;;  %195 = vst [vmem:[%s919_s27 + $0xa8] sm:$0xff] %v194_v22 }
  0x1e   : > { %197 = vst [vmem:[%s919_s27 + $0xb0] sm:$0xff] %v196_v23  ;;  %199 = vst [vmem:[%s919_s27 + $0xb8] sm:$0xff] %v198_v24  ;;  %v200_v25 = vld [vmem:[%s911_s26 + $0x300] sm:$0xff]  ;;  %v202_v26 = vld [vmem:[%s911_s26 + $0x308] sm:$0xff] }
  0x1f   : > { %v204_v27 = vld [vmem:[%s911_s26 + $0x340] sm:$0xff]  ;;  %201 = vst [vmem:[%s919_s27 + $0xc0] sm:$0xff] %v200_v25  ;;  %203 = vst [vmem:[%s919_s27 + $0xc8] sm:$0xff] %v202_v26  ;;  %v206_v28 = vld [vmem:[%s911_s26 + $0x348] sm:$0xff] }
  0x20   : > { %205 = vst [vmem:[%s919_s27 + $0xd0] sm:$0xff] %v204_v27  ;;  %v208_v29 = vld [vmem:[%s911_s26 + $0x380] sm:$0xff]  ;;  %v210_v30 = vld [vmem:[%s911_s26 + $0x388] sm:$0xff]  ;;  %207 = vst [vmem:[%s919_s27 + $0xd8] sm:$0xff] %v206_v28 }
  0x21   : > { %209 = vst [vmem:[%s919_s27 + $0xe0] sm:$0xff] %v208_v29  ;;  %211 = vst [vmem:[%s919_s27 + $0xe8] sm:$0xff] %v210_v30  ;;  %v212_v31 = vld [vmem:[%s911_s26 + $0x3c0] sm:$0xff]  ;;  %v214_v32 = vld [vmem:[%s911_s26 + $0x3c8] sm:$0xff] }
  0x22   : > { %v216_v33 = vld [vmem:[%s911_s26 + $0x400] sm:$0xff]  ;;  %213 = vst [vmem:[%s919_s27 + $0xf0] sm:$0xff] %v212_v31  ;;  %215 = vst [vmem:[%s919_s27 + $0xf8] sm:$0xff] %v214_v32  ;;  %v218_v34 = vld [vmem:[%s911_s26 + $0x408] sm:$0xff] }
  0x23   : > { %217 = vst [vmem:[%s919_s27 + $0x100] sm:$0xff] %v216_v33  ;;  %v220_v35 = vld [vmem:[%s911_s26 + $0x440] sm:$0xff]  ;;  %v222_v36 = vld [vmem:[%s911_s26 + $0x448] sm:$0xff]  ;;  %219 = vst [vmem:[%s919_s27 + $0x108] sm:$0xff] %v218_v34 }
  0x24   : > { %221 = vst [vmem:[%s919_s27 + $0x110] sm:$0xff] %v220_v35  ;;  %223 = vst [vmem:[%s919_s27 + $0x118] sm:$0xff] %v222_v36 }
  0x25 PF: > { %p701_p5 = scmp.ge.s32.totalorder %s850_s16, 1  ;;  %p228_p6 = scmp.lt.s32.totalorder %s850_s16, 5 }
  0x27   : > { %p229_p7 = pnand %p701_p5, %p228_p6 }
  0x28   : > { %s235_s28 = sand.u32 (!%p229_p7), 1, %s842_s14   ;;  %s702_s6 = sshll.u32 (!%p229_p7), %s695_s2, 2 }
  0x29   : > { %232 = sbr.rel (%p229_p7) target bundleno = 293 (0x125), region = 51  ;;  %p259_p8 = scmp.lt.s32.totalorder (!%p229_p7), %s702_s6, 15 }
  0x2a   : > { %s746_s4 = smul.u32 (!%p229_p7), 288, %s235_s28 }
  0x2c   : > { %s998_s5 = scalar_lea.vmem (!%p229_p7), [#allocation3], %s746_s4 }
  0x2e   : > { %v993_v37 = vld.sshfl [vmem:[%s1064_s0] sm:$0x11 pattern:$0x75316420]  ;;  %v307_v38 = vlaneseq  ;;  %v852_v41 = vmov 1966171168  }
  0x2f   : > { %v301_v39 = vld [vmem:[#allocation2] sm:$0x1]  ;;  %v321_v42 = vunpack.c.l.s4 %v852_v41  ;;  %v853_v43 = vmov 0   ;;  %v774_v44 = vld [vmem:[%s998_s5 + $0xe4] ss:$16 sps:$4 sm:$0xff]   ;;  %v319_v45 = vcombine.high %v993_v37, %v993_v37  ;;  %vm515_vm0 = vcmask 130048  }
  0x30   : > { %v996_v40 = vshrl.u32 %v307_v38, 7  ;;  %773 = vset.pattern.permute.xlu0 %v853_v43  ;;  %v776_v47 = vld [vmem:[%s998_s5 + $0xec] ss:$16 sps:$4 sm:$0xff]   ;;  %519 = vmatprep.subr.bf16.mxu0 %v774_v44  ;;  %v778_v48 = vld [vmem:[%s998_s5 + $0xe0] ss:$16 sps:$4 sm:$0xff]   ;;  %s1072_s6 = smov (!%p259_p8, %s702_s6), 15 }
  0x31   : > { %304 = vperm.xlu0 %773, %v301_v39   ;;  %v322_v46 = vunpack.c.0.s8 %v321_v42  ;;  %v779_v49 = vld [vmem:[%s998_s5 + $0xe8] ss:$16 sps:$4 sm:$0xff]   ;;  %560 = vmatprep.subr.bf16.mxu1 %v776_v47  ;;  %v780_v51 = vld [vmem:[%s998_s5 + $0xc4] ss:$16 sps:$4 sm:$0xff]   ;;  %v782_v52 = vld [vmem:[%s998_s5 + $0xcc] ss:$16 sps:$4 sm:$0xff]   ;;  %s261_s9 = scalar_lea.vmem %s1067_s3, %s1072_s6 }
  0x32   : > { %520 = vmatpush1.bf16.msra.mxu0 %v778_v48  ;;  %561 = vmatpush1.bf16.msra.mxu1 %v779_v49  ;;  %v784_v53 = vld [vmem:[%s998_s5 + $0xc0] ss:$16 sps:$4 sm:$0xff]   ;;  %v785_v55 = vld [vmem:[%s998_s5 + $0xc8] ss:$16 sps:$4 sm:$0xff]   ;;  %v786_v56 = vld [vmem:[%s998_s5 + $0xa4] ss:$16 sps:$4 sm:$0xff]  }
  0x33   : > { %v1007_v50 = vsub.s32 %v322_v46, %v996_v40  ;;  %521 = vmatprep.subr.bf16.mxu0 %v780_v51  ;;  %562 = vmatprep.subr.bf16.mxu1 %v782_v52  ;;  %v788_v57 = vld [vmem:[%s998_s5 + $0xac] ss:$16 sps:$4 sm:$0xff]   ;;  %v790_v58 = vld [vmem:[%s998_s5 + $0xa0] ss:$16 sps:$4 sm:$0xff]   ;;  %v791_v59 = vld [vmem:[%s998_s5 + $0xa8] ss:$16 sps:$4 sm:$0xff]  }
  0x34   : > { %v792_v60 = vld [vmem:[%s998_s5 + $0x84] ss:$16 sps:$4 sm:$0xff]   ;;  %v794_v61 = vld [vmem:[%s998_s5 + $0x8c] ss:$16 sps:$4 sm:$0xff]   ;;  %v796_v62 = vld [vmem:[%s998_s5 + $0x80] ss:$16 sps:$4 sm:$0xff]  }
  0x35   : > { %v333_v54 = vrot.slane %v319_v45, %v1007_v50  ;;  %v797_v63 = vld [vmem:[%s998_s5 + $0x88] ss:$16 sps:$4 sm:$0xff]   ;;  %v798_v0 = vld [vmem:[%s998_s5 + $0x64] ss:$16 sps:$4 sm:$0xff]   ;;  %v800_v1 = vld [vmem:[%s998_s5 + $0x6c] ss:$16 sps:$4 sm:$0xff]   ;;  %v326_v20 = vrot.slane %v993_v37, %v1007_v50 }
  0x36   : > { %522 = vmatpush1.bf16.msra.mxu0 %v784_v53  ;;  %563 = vmatpush1.bf16.msra.mxu1 %v785_v55  ;;  %v802_v2 = vld [vmem:[%s998_s5 + $0x60] ss:$16 sps:$4 sm:$0xff]   ;;  %v803_v3 = vld [vmem:[%s998_s5 + $0x68] ss:$16 sps:$4 sm:$0xff]   ;;  %v804_v4 = vld [vmem:[%s998_s5 + $0x44] ss:$16 sps:$4 sm:$0xff]  }
  0x37   : > { %740 = vmatprep.mubr.msk.bf16.mxu0 %vm515_vm0, %v333_v54  ;;  %741 = vmatprep.mubr.msk.bf16.mxu1 %vm515_vm0, %v333_v54  ;;  %v806_v5 = vld [vmem:[%s998_s5 + $0x4c] ss:$16 sps:$4 sm:$0xff]   ;;  %v808_v6 = vld [vmem:[%s998_s5 + $0x40] ss:$16 sps:$4 sm:$0xff]   ;;  %v809_v7 = vld [vmem:[%s998_s5 + $0x48] ss:$16 sps:$4 sm:$0xff]  }
  0x38   : > { %523 = vmatprep.subr.bf16.mxu0 %v786_v56  ;;  %564 = vmatprep.subr.bf16.mxu1 %v788_v57  ;;  %v810_v8 = vld [vmem:[%s998_s5 + $0x24] ss:$16 sps:$4 sm:$0xff]   ;;  %v812_v9 = vld [vmem:[%s998_s5 + $0x2c] ss:$16 sps:$4 sm:$0xff]   ;;  %v814_v10 = vld [vmem:[%s998_s5 + $0x20] ss:$16 sps:$4 sm:$0xff]  }
  0x39   : > { %v815_v11 = vld [vmem:[%s998_s5 + $0x28] ss:$16 sps:$4 sm:$0xff]   ;;  %v816_v12 = vld [vmem:[%s998_s5 + $0x4] ss:$16 sps:$4 sm:$0xff]   ;;  %v818_v13 = vld [vmem:[%s998_s5 + $0xc] ss:$16 sps:$4 sm:$0xff]  }
  0x3a   : > { %524 = vmatpush1.bf16.msra.mxu0 %v790_v58  ;;  %565 = vmatpush1.bf16.msra.mxu1 %v791_v59  ;;  %v820_v14 = vld [vmem:[%s998_s5] ss:$16 sps:$4 sm:$0xff]   ;;  %v821_v15 = vld [vmem:[%s998_s5 + $0x8] ss:$16 sps:$4 sm:$0xff]   ;;  %v822_v16 = vld [vmem:[%s998_s5 + $0x104] ss:$16 sps:$4 sm:$0xff]  }
  0x3b   : > { %525 = vmatprep.subr.bf16.mxu0 %v792_v60  ;;  %566 = vmatprep.subr.bf16.mxu1 %v794_v61  ;;  %v824_v17 = vld [vmem:[%s998_s5 + $0x10c] ss:$16 sps:$4 sm:$0xff]   ;;  %v826_v18 = vld [vmem:[%s998_s5 + $0x100] ss:$16 sps:$4 sm:$0xff]   ;;  %v827_v19 = vld [vmem:[%s998_s5 + $0x108] ss:$16 sps:$4 sm:$0xff]  }
  0x3c   : > { %v309_v21 = vsub.s32 0, %v996_v40  ;;  %vm636_vm1 = vcmp.lt.s32.totalorder %v307_v38, 512 }
  0x3e   : > { %526 = vmatpush1.bf16.msra.mxu0 %v796_v62  ;;  %567 = vmatpush1.bf16.msra.mxu1 %v797_v63 }
  0x3f   : > { %527 = vmatprep.subr.bf16.mxu0 %v798_v0  ;;  %568 = vmatprep.subr.bf16.mxu1 %v800_v1 }
  0x42   : > { %528 = vmatpush1.bf16.msra.mxu0 %v802_v2  ;;  %569 = vmatpush1.bf16.msra.mxu1 %v803_v3 }
  0x43   : > { %529 = vmatprep.subr.bf16.mxu0 %v804_v4  ;;  %570 = vmatprep.subr.bf16.mxu1 %v806_v5 }
  0x46   : > { %530 = vmatpush1.bf16.msra.mxu0 %v808_v6  ;;  %571 = vmatpush1.bf16.msra.mxu1 %v809_v7 }
  0x47   : > { %531 = vmatprep.subr.bf16.mxu0 %v810_v8  ;;  %572 = vmatprep.subr.bf16.mxu1 %v812_v9 }
  0x4a   : > { %532 = vmatpush1.bf16.msra.mxu0 %v814_v10  ;;  %573 = vmatpush1.bf16.msra.mxu1 %v815_v11 }
  0x4b   : > { %533 = vmatprep.subr.bf16.mxu0 %v816_v12  ;;  %574 = vmatprep.subr.bf16.mxu1 %v818_v13 }
  0x4e   : > { %534 = vmatpush1.bf16.msra.mxu0 %v820_v14  ;;  %575 = vmatpush1.bf16.msra.mxu1 %v821_v15 }
  0x4f   : > { %549 = vmatprep.subr.bf16.mxu0 %v822_v16  ;;  %590 = vmatprep.subr.bf16.mxu1 %v824_v17 }
  0x52   : > { %550 = vmatpush2.bf16.msra.mxu0 %v826_v18  ;;  %591 = vmatpush2.bf16.msra.mxu1 %v827_v19 }
  0x55   : > { %552 = vmatmul.mubr.bf16.vlgmr.msra.gmra.mxu0 %v326_v20  ;;  %593 = vmatmul.mubr.bf16.vlgmr.msra.gmra.mxu1 %v326_v20 }
  0xac   : > { %v305_v22 = vpop.permute.xlu0 %304 }
  0xad   : > { %v310_v23 = vrot.slane %v305_v22, %v309_v21 }
 0x115   : > { %v553_v24 = vpop.f32.mrf.mxu0  ;;  %v594_v25 = vpop.f32.mrf.mxu1 }
 0x116   : > { %v554_v26 = vadd.f32 %v553_v24, %v310_v23  ;;  %v595_v27 = vadd.f32 %v594_v25, %v310_v23 }
 0x117   : > { %v555_v28 = vpop.f32.mrf.mxu0  ;;  %v596_v29 = vpop.f32.mrf.mxu1 }
 0x118   : > { %v556_v30 = vadd.f32 %v555_v28, %v310_v23  ;;  %v597_v31 = vadd.f32 %v596_v29, %v310_v23  ;;  %v601_v34 = vmax.f32 %v554_v26, 0.0  ;;  %v603_v35 = vmax.f32 %v595_v27, 0.0 }
 0x119   : > { %v557_v32 = vpop.f32.mrf.mxu0  ;;  %v598_v33 = vpop.f32.mrf.mxu1 }
 0x11a   : > { %v602_v36 = vmax.f32 %v556_v30, 0.0  ;;  %v604_v37 = vmax.f32 %v597_v31, 0.0 }
 0x11b   : > { %v558_v39 = vpop.f32.mrf.mxu0  ;;  %v599_v40 = vpop.f32.mrf.mxu1 }
 0x11c   : > { %v609_v41 = vcombine.low %v601_v34, %v602_v36  ;;  %v610_v42 = vcombine.low %v603_v35, %v604_v37 }
 0x11e   : > { %v617_v43 = vrot.slane %v609_v41, %v1007_v50  ;;  %v624_v44 = vrot.slane %v610_v42, %v1007_v50 }
 0x120   : > { %v625_v45 = vcombine.low %v617_v43, %v624_v44 }
 0x122   : > { %v632_v46 = vrot.slane %v625_v45, %v1007_v50 }
 0x124   : > { %638 = vst.msk [vmem:[%s261_s9] sm:$0xf] %vm636_vm1, %v632_v46 }
 0x125 PF: > { %p12_p9 = scmp.ge.s32.totalorder %s894_s17, 6   ;;  %s1068_s14 = smov %s846_s15 }
 0x126   : > { %s1069_s15 = smov %s903_s20  ;;  %s1070_s16 = smov %s894_s17 }
 0x127   :  { %14 = sbr.rel (!%p12_p9) target bundleno = 5 (0x5), region = 90 }

</bundles_post_ra>
